<compile_context>
chip_gen: v7x
topology: tpu7x:2x2x1
jax: 0.10.0
libtpu: 0.0.40
codegen_flags: <defaults>
</compile_context>

<pallas_src>
import math
from functools import partial

import jax
import jax.numpy as jnp
from jax import lax
from jax.experimental import pallas as pl
from jax.experimental.pallas import tpu as pltpu


# ----------------------------------------------------------------------------- utils

def _pick_tile(dim, preferred, aligns=(256, 128, 8)):
    """Largest multiple of one of `aligns` that divides `dim` and is <= preferred."""
    if dim <= preferred:
        return dim
    for align in aligns:
        t = (preferred // align) * align
        while t >= align:
            if dim % t == 0:
                return t
            t -= align
    return dim


def _physical_vmem_bytes():
    """Per-core physical VMEM; fall back to the v7x 64 MiB floor if unknown."""
    try:
        info = pltpu.get_tpu_info()
        for attr in ("vmem_capacity_bytes", "vmem_size_bytes", "vmem_bytes"):
            v = getattr(info, attr, None)
            if v:
                return int(v)
    except Exception:
        pass
    return 64 * 1024 * 1024


def _vmem_limit(needed_bytes, phys_bytes):
    """Scoped-VMEM limit: headroom over the tile footprint, capped at ~7/8 physical."""
    cap = int(phys_bytes) * 7 // 8           # headroom for Mosaic internal scratch
    return min(max(int(1.5 * needed_bytes), 32 * 1024 * 1024), cap)


# --------------------------------------------------- fused MHA + residual + LayerNorm

def mha_ln_kernel(x_ref, pm_ref, wq_ref, wk_ref, wv_ref, bq_ref, bk_ref, bv_ref,
                  wo_ref, bo_ref, g1_ref, be1_ref, o_ref, ctx_ref,
                  *, num_heads, is_causal, scale, eps, tile_q):
    # x_ref:(1,S,H)  pm_ref:(1,S,1)  w*:(H,H)  b*/g1/be1:(1,H)
    # o_ref:(1,tile_q,H)  ctx_ref: VMEM (tile_q,H) f32 scratch
    qi = pl.program_id(1)
    S = x_ref.shape[1]
    H = x_ref.shape[2]
    dh = H // num_heads
    dot_dtype = x_ref.dtype

    q_start = pl.multiple_of(qi * tile_q, tile_q)
    x_full = x_ref[0]                                   # (S, H)  for K / V
    x_q = x_ref[0, pl.ds(q_start, tile_q), :]           # (tile_q, H)  query rows
    pm_q = pm_ref[0, pl.ds(q_start, tile_q), :]         # (tile_q, 1)

    # Full-width projections on the MXU (f32 accumulation), scale folded into q.
    q = (jnp.dot(x_q, wq_ref[...], preferred_element_type=jnp.float32)
         + bq_ref[...]) * scale
    k = jnp.dot(x_full, wk_ref[...], preferred_element_type=jnp.float32) + bk_ref[...]
    v = jnp.dot(x_full, wv_ref[...], preferred_element_type=jnp.float32) + bv_ref[...]
    q = q.astype(dot_dtype)
    k = k.astype(dot_dtype)
    v = v.astype(dot_dtype)

    # Masks built once (hoisted out of the per-head loop).
    pad_row = pm_q == 0.0                                # query-row padding (fill -1e9)
    if is_causal:
        rows = lax.broadcasted_iota(jnp.int32, (tile_q, S), 0) + q_start
        cols = lax.broadcasted_iota(jnp.int32, (tile_q, S), 1)
        causal_add = jnp.where(cols > rows, jnp.float32(-jnp.inf), jnp.float32(0.0))

    # Per-head scores / softmax / context (dh-wide matmuls are inherent to MHA).
    for h in range(num_heads):                           # static unroll, nh small
        q_h = q[:, h * dh:(h + 1) * dh]
        k_h = k[:, h * dh:(h + 1) * dh]
        v_h = v[:, h * dh:(h + 1) * dh]

        s = lax.dot_general(q_h, k_h, (((1,), (1,)), ((), ())),
                            preferred_element_type=jnp.float32)      # (tile_q, S)
        s = jnp.where(pad_row, -1e9, s)                  # masked_fill on query rows
        if is_causal:
            s = s + causal_add

        m = jnp.max(s, axis=-1, keepdims=True)
        e = jnp.exp(s - m)
        denom = jnp.sum(e, axis=-1, keepdims=True)
        # TODO(synk): attention-prob dropout == identity (eval mode).
        ctx = jnp.dot(e.astype(dot_dtype), v_h, preferred_element_type=jnp.float32)
        # Deferred softmax normalization via EUP approx reciprocal.
        ctx_ref[:, h * dh:(h + 1) * dh] = ctx * pl.reciprocal(denom, approx=True)

    # Single full-width output projection + fused residual + LayerNorm-1.
    attn = jnp.dot(ctx_ref[...].astype(dot_dtype), wo_ref[...],
                   preferred_element_type=jnp.float32) + bo_ref[...]
    z = x_q.astype(jnp.float32) + attn
    u = jnp.mean(z, axis=-1, keepdims=True)
    d = z - u
    var = jnp.mean(d * d, axis=-1, keepdims=True)
    o_ref[0] = (g1_ref[...] * (d * lax.rsqrt(var + eps)) + be1_ref[...]).astype(o_ref.dtype)


def multi_head_attention_ln(hidden, padding_mask, wq, bq, wk, bk, wv, bv, wo, bo,
                            gamma1, beta1, *, num_heads, is_causal, eps,
                            tile_q=None, out_dtype=None):
    B, S, H = hidden.shape
    assert H % num_heads == 0
    dh = H // num_heads
    scale = 1.0 / math.sqrt(dh)
    out_dtype = out_dtype or hidden.dtype

    if tile_q is None:
        tile_q = _pick_tile(S, 256, aligns=(128, 8))
    assert S % tile_q == 0 and (tile_q % 8 == 0 or tile_q == S)
    n_q = S // tile_q

    if padding_mask is None:
        pm = jnp.ones((B, S, 1), jnp.float32)
    else:
        pm = padding_mask.reshape(B, S, 1).astype(jnp.float32)

    row = lambda t: t.reshape(1, H).astype(jnp.float32)
    itemsize = jnp.dtype(hidden.dtype).itemsize
    phys = _physical_vmem_bytes()
    vmem_needed = (2 * itemsize * (S * H + tile_q * H)      # x / out (double-buffered)
                   + 2 * itemsize * 4 * H * H               # wq/wk/wv/wo
                   + 4 * (3 * S * H + 2 * tile_q * H)       # q/k/v + ctx/z in f32
                   + 2 * 4 * (S + 7 * H))                   # pm, biases, LN params
    vmem_lim = _vmem_limit(vmem_needed, phys)

    cost = pl.CostEstimate(
        flops=int(B * (8 * S * H * H + 4 * S * S * H)),
        transcendentals=int(B * num_heads * S * S),
        bytes_accessed=int(itemsize * (2 * B * S * H + 4 * H * H)
                           + 4 * (B * S + 8 * H)),
    )

    kern = partial(mha_ln_kernel, num_heads=num_heads, is_causal=is_causal,
                   scale=scale, eps=eps, tile_q=tile_q)
    const2 = lambda b, qi: (0, 0)

    return pl.pallas_call(
        kern,
        out_shape=jax.ShapeDtypeStruct((B, S, H), out_dtype),
        grid_spec=pltpu.PrefetchScalarGridSpec(
            num_scalar_prefetch=0,
            grid=(B, n_q),
            in_specs=[
                pl.BlockSpec((1, S, H), lambda b, qi: (b, 0, 0)),   # x (full seq)
                pl.BlockSpec((1, S, 1), lambda b, qi: (b, 0, 0)),   # padding mask
                pl.BlockSpec((H, H), const2),                       # wq
                pl.BlockSpec((H, H), const2),                       # wk
                pl.BlockSpec((H, H), const2),                       # wv
                pl.BlockSpec((1, H), const2),                       # bq
                pl.BlockSpec((1, H), const2),                       # bk
                pl.BlockSpec((1, H), const2),                       # bv
                pl.BlockSpec((H, H), const2),                       # wo
                pl.BlockSpec((1, H), const2),                       # bo
                pl.BlockSpec((1, H), const2),                       # ln1 gamma
                pl.BlockSpec((1, H), const2),                       # ln1 beta
            ],
            out_specs=pl.BlockSpec((1, tile_q, H), lambda b, qi: (b, qi, 0)),
            scratch_shapes=[pltpu.VMEM((tile_q, H), jnp.float32)],
        ),
        compiler_params=pltpu.CompilerParams(
            dimension_semantics=("parallel", "parallel"),
            vmem_limit_bytes=vmem_lim),
        cost_estimate=cost,
    )(hidden, pm, wq, wk, wv, row(bq), row(bk), row(bv), wo, row(bo),
      row(gamma1), row(beta1))


# ------------------------------------------------ fused FFN + residual + LayerNorm-2

def ffn_ln_kernel(x_ref, w1_ref, b1_ref, w2_ref, b2_ref, g2_ref, be2_ref,
                  o_ref, acc_ref, *, eps):
    # x_ref:(tm,H)  w1:(H,tn)  b1:(1,tn)  w2:(tn,H)  b2/g2/be2:(1,H)  acc:(tm,H) f32
    j = pl.program_id(1)

    @pl.when(j == 0)
    def _init():
        acc_ref[...] = jnp.zeros_like(acc_ref)

    # Matmuls in the operand dtype; f32 accumulation on the MXU.
    h = jnp.dot(x_ref[...], w1_ref[...], preferred_element_type=jnp.float32)
    h = h + b1_ref[...]

    # GELU (tanh approximation) kept in f32 (safe on v5e which lacks bf16 VALU/EUP).
    # TODO(synk): on v6e/v7x the GELU polynomial could run in bf16 for 2x VPU throughput.
    c = math.sqrt(2.0 / math.pi)
    act = 0.5 * h * (1.0 + jnp.tanh(c * (h + 0.044715 * (h * h * h))))

    # TODO(synk): FFN dropout == identity (eval mode).
    acc_ref[...] += jnp.dot(act.astype(w2_ref.dtype), w2_ref[...],
                            preferred_element_type=jnp.float32)

    @pl.when(j == pl.num_programs(1) - 1)
    def _finalize():
        ffn = acc_ref[...] + b2_ref[...]
        z = x_ref[...].astype(jnp.float32) + ffn             # fused residual
        u = jnp.mean(z, axis=-1, keepdims=True)
        d = z - u
        var = jnp.mean(d * d, axis=-1, keepdims=True)
        o_ref[...] = (g2_ref[...] * (d * lax.rsqrt(var + eps))
                      + be2_ref[...]).astype(o_ref.dtype)


def positionwise_ffn_ln(hidden, w1, b1, w2, b2, gamma2, beta2, *, eps,
                        tile_m=None, tile_n=None, out_dtype=None):
    """hidden: [B,S,H]; w1: [H,4H]; b1: [4H]; w2: [4H,H]; b2/gamma2/beta2: [H]."""
    B, S, H = hidden.shape
    H4 = w1.shape[1]
    M = B * S
    out_dtype = out_dtype or hidden.dtype
    x2d = hidden.reshape(M, H)
    itemsize = jnp.dtype(hidden.dtype).itemsize
    out_itemsize = jnp.dtype(out_dtype).itemsize
    phys = _physical_vmem_bytes()

    # tile_m is the arithmetic-intensity knob for the streamed w1/w2 blocks
    # (~2*tile_m/itemsize flops per weight byte): never default below 256.
    if tile_n is None:
        tile_n = _pick_tile(H4, 512, aligns=(256, 128))
    if tile_m is None:
        pref_m = 768 if phys > (96 << 20) else 512    # v5e/v6e: 128 MiB VMEM; v7x: 64 MiB
        tile_m = _pick_tile(M, pref_m, aligns=(256, 128, 8))

    def footprint(tm, tn):
        db = 2 * itemsize * (tm * H + H * tn + tn + tn * H + 3 * H)   # double-buffered
        db += 2 * out_itemsize * tm * H                               # out
        return db + 4 * tm * H                                        # f32 accumulator

    budget = phys * 3 // 4
    # Shrink tile_n first (keeps weight-stream intensity), then tile_m.
    while footprint(tile_m, tile_n) > budget and tile_n > 256 and tile_n % 256 == 0:
        tile_n //= 2
    while footprint(tile_m, tile_n) > budget and tile_m > 8 and tile_m % 16 == 0:
        tile_m //= 2

    assert M % tile_m == 0 and (tile_m % 8 == 0 or tile_m == M)
    assert H4 % tile_n == 0 and (tile_n % 128 == 0 or tile_n == H4)
    vmem_lim = _vmem_limit(footprint(tile_m, tile_n), phys)

    # bytes_accessed accounts for weight re-streaming: w1/w2 are read M/tile_m times.
    n_i = M // tile_m
    cost = pl.CostEstimate(
        flops=int(4 * M * H * H4 + 10 * M * H),
        transcendentals=int(M * H4 + M),
        bytes_accessed=int(itemsize * (M * H + n_i * 2 * H * H4 + H4)
                           + out_itemsize * M * H + 4 * 3 * H),
    )

    out2d = pl.pallas_call(
        partial(ffn_ln_kernel, eps=eps),
        out_shape=jax.ShapeDtypeStruct((M, H), out_dtype),
        grid_spec=pltpu.PrefetchScalarGridSpec(
            num_scalar_prefetch=0,
            grid=(M // tile_m, H4 // tile_n),             # reduction (4H) axis last
            in_specs=[
                pl.BlockSpec((tile_m, H), lambda i, j: (i, 0)),    # x / residual rows
                pl.BlockSpec((H, tile_n), lambda i, j: (0, j)),    # w1 streamed over 4H
                pl.BlockSpec((1, tile_n), lambda i, j: (0, j)),    # b1 slice
                pl.BlockSpec((tile_n, H), lambda i, j: (j, 0)),    # w2 streamed over 4H
                pl.BlockSpec((1, H), lambda i, j: (0, 0)),         # b2
                pl.BlockSpec((1, H), lambda i, j: (0, 0)),         # ln2 gamma
                pl.BlockSpec((1, H), lambda i, j: (0, 0)),         # ln2 beta
            ],
            out_specs=pl.BlockSpec((tile_m, H), lambda i, j: (i, 0)),
            scratch_shapes=[pltpu.VMEM((tile_m, H), jnp.float32)],
        ),
        compiler_params=pltpu.CompilerParams(
            dimension_semantics=("parallel", "arbitrary"),
            vmem_limit_bytes=vmem_lim),
        cost_estimate=cost,
    )(x2d, w1, b1.reshape(1, H4).astype(jnp.float32), w2,
      b2.reshape(1, H).astype(jnp.float32),
      gamma2.reshape(1, H).astype(jnp.float32),
      beta2.reshape(1, H).astype(jnp.float32))
    return out2d.reshape(B, S, H)


# --------------------------------------------------------------------- full block

def transformer_encoder_block(hidden, padding_mask, params, *, num_heads,
                              is_causal=False, norm_first=False, eps=1e-12,
                              compute_dtype=None, attn_tile_q=None,
                              ffn_tile_m=None, ffn_tile_n=None):
    if norm_first:
        # TODO(synk): pre-norm SublayerConnection path (norm_first=True) not implemented.
        raise NotImplementedError("norm_first=True path not implemented")

    out_dtype = hidden.dtype
    cd = jnp.dtype(compute_dtype) if compute_dtype is not None else hidden.dtype
    c = lambda t: t.astype(cd)   # cast matmul operands (weights/activations) at wrap time

    # MHA + residual + LayerNorm-1 (fused); h1 stays in the matmul compute dtype.
    h1 = multi_head_attention_ln(
        c(hidden), padding_mask,
        c(params["wq"]), params["bq"], c(params["wk"]), params["bk"],
        c(params["wv"]), params["bv"], c(params["wo"]), params["bo"],
        params["ln1_g"], params["ln1_b"],
        num_heads=num_heads, is_causal=is_causal, eps=eps,
        tile_q=attn_tile_q, out_dtype=cd)

    # FFN + residual + LayerNorm-2 (fused); final output back in the input dtype.
    return positionwise_ffn_ln(
        h1, c(params["w1"]), params["b1"], c(params["w2"]), params["b2"],
        params["ln2_g"], params["ln2_b"], eps=eps,
        tile_m=ffn_tile_m, tile_n=ffn_tile_n, out_dtype=out_dtype)


# --------------------------------------------------------------------- JAX reference

def reference_block(x, pmask, p, *, num_heads, is_causal, eps=1e-12):
    B, S, H = x.shape
    dh = H // num_heads
    lin = lambda t, w, b: t @ w + b

    q = lin(x, p["wq"], p["bq"]).reshape(B, S, num_heads, dh).transpose(0, 2, 1, 3)
    k = lin(x, p["wk"], p["bk"]).reshape(B, S, num_heads, dh).transpose(0, 2, 1, 3)
    v = lin(x, p["wv"], p["bv"]).reshape(B, S, num_heads, dh).transpose(0, 2, 1, 3)
    corr = jnp.einsum("bhqd,bhkd->bhqk", q, k) / math.sqrt(dh)
    if pmask is not None:
        corr = jnp.where(pmask.reshape(B, 1, S, 1) == 0, -1e9, corr)
    if is_causal:
        cm = jnp.triu(jnp.full((S, S), -jnp.inf, dtype=jnp.float32), k=1)
        corr = corr + cm[None, None]
    attn = jax.nn.softmax(corr, axis=-1)
    ctx = jnp.einsum("bhqk,bhkd->bhqd", attn, v).transpose(0, 2, 1, 3).reshape(B, S, H)
    attn_out = lin(ctx, p["wo"], p["bo"])

    def ln(t, g, b):
        u = t.mean(-1, keepdims=True)
        s = ((t - u) ** 2).mean(-1, keepdims=True)
        return g * ((t - u) / jnp.sqrt(s + eps)) + b

    h1 = ln(x + attn_out, p["ln1_g"], p["ln1_b"])
    t = lin(h1, p["w1"], p["b1"])
    act = 0.5 * t * (1.0 + jnp.tanh(math.sqrt(2.0 / math.pi) * (t + 0.044715 * t ** 3)))
    return ln(h1 + lin(act, p["w2"], p["b2"]), p["ln2_g"], p["ln2_b"])


# ----------------------------------------------------------------------------- main

if __name__ == "__main__":
    key = jax.random.PRNGKey(0)
    # hidden=128 keeps every output block lane-dense (multiple of 128 lanes).
    B, S, H, NH = 2, 8, 128, 4
    H4 = 4 * H
    ks = jax.random.split(key, 16)

    def xavier(k, fan_in, fan_out):        # x @ w + b convention ([in, out])
        std = math.sqrt(2.0 / (fan_in + fan_out))
        return std * jax.random.normal(k, (fan_in, fan_out), dtype=jnp.float32)

    def bias(k, fan_in, n):                # nn.Linear default bias init
        bound = 1.0 / math.sqrt(fan_in)
        return jax.random.uniform(k, (n,), jnp.float32, -bound, bound)

    params = dict(
        wq=xavier(ks[0], H, H), bq=bias(ks[1], H, H),
        wk=xavier(ks[2], H, H), bk=bias(ks[3], H, H),
        wv=xavier(ks[4], H, H), bv=bias(ks[5], H, H),
        wo=xavier(ks[6], H, H), bo=bias(ks[7], H, H),
        w1=xavier(ks[8], H, H4), b1=bias(ks[9], H, H4),
        w2=xavier(ks[10], H4, H), b2=bias(ks[11], H4, H),
        ln1_g=1.0 + 0.05 * jax.random.normal(ks[12], (H,), jnp.float32),
        ln1_b=0.05 * jax.random.normal(ks[13], (H,), jnp.float32),
        ln2_g=jnp.ones((H,), jnp.float32),
        ln2_b=jnp.zeros((H,), jnp.float32),
    )

    hidden = jax.random.normal(ks[14], (B, S, H), dtype=jnp.float32)
    padding_mask = jnp.ones((B, S), jnp.float32).at[1, 6:].set(0.0)  # pad last 2 of batch 1

    ref = reference_block(hidden, padding_mask, params, num_heads=NH, is_causal=True)

    # f32 run (ffn_tile_n=256 exercises the streamed-4H accumulate path at toy size).
    out = transformer_encoder_block(hidden, padding_mask, params,
                                    num_heads=NH, is_causal=True, ffn_tile_n=256)
    out = jax.block_until_ready(out)
    assert out.shape == (B, S, H)
    # Output is layer-normalized (O(1)); tolerance covers MXU pass differences and
    # the EUP approx-reciprocal softmax normalization.
    assert jnp.allclose(out, ref, atol=3e-2, rtol=3e-2), (
        f"f32 mismatch vs reference: max abs err = {float(jnp.max(jnp.abs(out - ref)))}")

    # bf16 matmul-operand mode (the main MXU lever from the perf review); loose
    # tolerance vs the f32 reference since operands are bf16-rounded.
    out_bf16 = transformer_encoder_block(hidden, padding_mask, params,
                                         num_heads=NH, is_causal=True,
                                         ffn_tile_n=256,
                                         compute_dtype=jnp.bfloat16)
    out_bf16 = jax.block_until_ready(out_bf16)
    assert out_bf16.shape == (B, S, H) and out_bf16.dtype == hidden.dtype
    assert bool(jnp.all(jnp.isfinite(out_bf16)))
    assert jnp.allclose(out_bf16, ref, atol=0.25, rtol=0.25), (
        f"bf16 mismatch vs reference: max abs err = "
        f"{float(jnp.max(jnp.abs(out_bf16 - ref)))}")

    print("KERNEL_OK")
</pallas_src>

<mosaic_0001>
module attributes {stable_mosaic.version = 11 : i64} {
  func.func @mha_ln_kernel(%arg0: i32, %arg1: i32, %arg2: memref<1x8x128xf32, #tpu.memory_space<vmem>>, %arg3: memref<1x8x1xf32, #tpu.memory_space<vmem>>, %arg4: memref<128x128xf32, #tpu.memory_space<vmem>>, %arg5: memref<128x128xf32, #tpu.memory_space<vmem>>, %arg6: memref<128x128xf32, #tpu.memory_space<vmem>>, %arg7: memref<1x128xf32, #tpu.memory_space<vmem>>, %arg8: memref<1x128xf32, #tpu.memory_space<vmem>>, %arg9: memref<1x128xf32, #tpu.memory_space<vmem>>, %arg10: memref<128x128xf32, #tpu.memory_space<vmem>>, %arg11: memref<1x128xf32, #tpu.memory_space<vmem>>, %arg12: memref<1x128xf32, #tpu.memory_space<vmem>>, %arg13: memref<1x128xf32, #tpu.memory_space<vmem>>, %arg14: memref<1x8x128xf32, #tpu.memory_space<vmem>>, %arg15: memref<8x128xf32, #tpu.memory_space<vmem>>) attributes {dimension_semantics = [#tpu.dimension_semantics<parallel>, #tpu.dimension_semantics<parallel>], iteration_bounds = array<i64: 2, 1>, scalar_prefetch = 0 : i64, scratch_operands = 1 : i64, tpu.core_type = #tpu.core_type<tc>, window_params = [{transform_indices = @transform_0, window_bounds = array<i64: 1, 8, 128>}, {transform_indices = @transform_1, window_bounds = array<i64: 1, 8, 1>}, {pipeline_mode = #tpu.pipeline_mode<synchronous>, transform_indices = @transform_2, window_bounds = array<i64: 128, 128>}, {pipeline_mode = #tpu.pipeline_mode<synchronous>, transform_indices = @transform_3, window_bounds = array<i64: 128, 128>}, {pipeline_mode = #tpu.pipeline_mode<synchronous>, transform_indices = @transform_4, window_bounds = array<i64: 128, 128>}, {pipeline_mode = #tpu.pipeline_mode<synchronous>, transform_indices = @transform_5, window_bounds = array<i64: 1, 128>}, {pipeline_mode = #tpu.pipeline_mode<synchronous>, transform_indices = @transform_6, window_bounds = array<i64: 1, 128>}, {pipeline_mode = #tpu.pipeline_mode<synchronous>, transform_indices = @transform_7, window_bounds = array<i64: 1, 128>}, {pipeline_mode = #tpu.pipeline_mode<synchronous>, transform_indices = @transform_8, window_bounds = array<i64: 128, 128>}, {pipeline_mode = #tpu.pipeline_mode<synchronous>, transform_indices = @transform_9, window_bounds = array<i64: 1, 128>}, {pipeline_mode = #tpu.pipeline_mode<synchronous>, transform_indices = @transform_10, window_bounds = array<i64: 1, 128>}, {pipeline_mode = #tpu.pipeline_mode<synchronous>, transform_indices = @transform_11, window_bounds = array<i64: 1, 128>}, {transform_indices = @transform_12, window_bounds = array<i64: 1, 8, 128>}]} {
    %c8_i32 = arith.constant 8 : i32
    %0 = arith.muli %arg1, %c8_i32 : i32
    %1 = tpu.assume_multiple %0, 8 : i32
    %c0 = arith.constant 0 : index
    %c0_0 = arith.constant 0 : index
    %c0_1 = arith.constant 0 : index
    %2 = vector.load %arg2[%c0, %c0_0, %c0_1] : memref<1x8x128xf32, #tpu.memory_space<vmem>>, vector<1x8x128xf32>
    %3 = vector.shape_cast %2 : vector<1x8x128xf32> to vector<8x128xf32>
    %c0_2 = arith.constant 0 : index
    %4 = arith.index_cast %1 : i32 to index
    %c0_3 = arith.constant 0 : index
    %5 = vector.load %arg2[%c0_2, %4, %c0_3] : memref<1x8x128xf32, #tpu.memory_space<vmem>>, vector<1x8x128xf32>
    %6 = vector.shape_cast %5 : vector<1x8x128xf32> to vector<8x128xf32>
    %c0_4 = arith.constant 0 : index
    %7 = arith.index_cast %1 : i32 to index
    %c0_5 = arith.constant 0 : index
    %8 = vector.load %arg3[%c0_4, %7, %c0_5] : memref<1x8x1xf32, #tpu.memory_space<vmem>>, vector<1x8x1xf32>
    %9 = vector.shape_cast %8 : vector<1x8x1xf32> to vector<8x1xf32>
    %c0_6 = arith.constant 0 : index
    %c0_7 = arith.constant 0 : index
    %10 = vector.load %arg4[%c0_6, %c0_7] : memref<128x128xf32, #tpu.memory_space<vmem>>, vector<128x128xf32>
    %cst = arith.constant dense<0.000000e+00> : vector<8x128xf32>
    %11 = tpu.matmul %6, %10, %cst {dimension_numbers = #tpu.dot_dimension_numbers<[1], [0], [0], [1], [0, 0, 1, 1], [], []>} : vector<8x128xf32>, vector<128x128xf32>, vector<8x128xf32> -> vector<8x128xf32>
    %c0_8 = arith.constant 0 : index
    %c0_9 = arith.constant 0 : index
    %12 = vector.load %arg7[%c0_8, %c0_9] : memref<1x128xf32, #tpu.memory_space<vmem>>, vector<1x128xf32>
    %13 = vector.broadcast %12 : vector<1x128xf32> to vector<8x128xf32>
    %14 = arith.addf %11, %13 : vector<8x128xf32>
    %cst_10 = arith.constant 0.176776692 : f32
    %15 = vector.broadcast %cst_10 : f32 to vector<8x128xf32>
    %16 = arith.mulf %14, %15 : vector<8x128xf32>
    %c0_11 = arith.constant 0 : index
    %c0_12 = arith.constant 0 : index
    %17 = vector.load %arg5[%c0_11, %c0_12] : memref<128x128xf32, #tpu.memory_space<vmem>>, vector<128x128xf32>
    %cst_13 = arith.constant dense<0.000000e+00> : vector<8x128xf32>
    %18 = tpu.matmul %3, %17, %cst_13 {dimension_numbers = #tpu.dot_dimension_numbers<[1], [0], [0], [1], [0, 0, 1, 1], [], []>} : vector<8x128xf32>, vector<128x128xf32>, vector<8x128xf32> -> vector<8x128xf32>
    %c0_14 = arith.constant 0 : index
    %c0_15 = arith.constant 0 : index
    %19 = vector.load %arg8[%c0_14, %c0_15] : memref<1x128xf32, #tpu.memory_space<vmem>>, vector<1x128xf32>
    %20 = vector.broadcast %19 : vector<1x128xf32> to vector<8x128xf32>
    %21 = arith.addf %18, %20 : vector<8x128xf32>
    %c0_16 = arith.constant 0 : index
    %c0_17 = arith.constant 0 : index
    %22 = vector.load %arg6[%c0_16, %c0_17] : memref<128x128xf32, #tpu.memory_space<vmem>>, vector<128x128xf32>
    %cst_18 = arith.constant dense<0.000000e+00> : vector<8x128xf32>
    %23 = tpu.matmul %3, %22, %cst_18 {dimension_numbers = #tpu.dot_dimension_numbers<[1], [0], [0], [1], [0, 0, 1, 1], [], []>} : vector<8x128xf32>, vector<128x128xf32>, vector<8x128xf32> -> vector<8x128xf32>
    %c0_19 = arith.constant 0 : index
    %c0_20 = arith.constant 0 : index
    %24 = vector.load %arg9[%c0_19, %c0_20] : memref<1x128xf32, #tpu.memory_space<vmem>>, vector<1x128xf32>
    %25 = vector.broadcast %24 : vector<1x128xf32> to vector<8x128xf32>
    %26 = arith.addf %23, %25 : vector<8x128xf32>
    %cst_21 = arith.constant 0.000000e+00 : f32
    %27 = vector.broadcast %cst_21 : f32 to vector<8x1xf32>
    %28 = arith.cmpf oeq, %9, %27 : vector<8x1xf32>
    %29 = tpu.iota {dimensions = array<i32: 0>} : vector<8x8xi32>
    %30 = vector.broadcast %1 : i32 to vector<8x8xi32>
    %31 = arith.addi %29, %30 : vector<8x8xi32>
    %32 = tpu.iota {dimensions = array<i32: 1>} : vector<8x8xi32>
    %33 = arith.cmpi sgt, %32, %31 : vector<8x8xi32>
    %cst_22 = arith.constant 0xFF800000 : f32
    %cst_23 = arith.constant 0.000000e+00 : f32
    %34 = vector.broadcast %cst_22 : f32 to vector<8x8xf32>
    %35 = vector.broadcast %cst_23 : f32 to vector<8x8xf32>
    %36 = arith.select %33, %34, %35 : vector<8x8xi1>, vector<8x8xf32>
    %37 = vector.extract_strided_slice %16 {offsets = [0, 0], sizes = [8, 32], strides = [1, 1]} : vector<8x128xf32> to vector<8x32xf32>
    %38 = vector.extract_strided_slice %21 {offsets = [0, 0], sizes = [8, 32], strides = [1, 1]} : vector<8x128xf32> to vector<8x32xf32>
    %39 = vector.extract_strided_slice %26 {offsets = [0, 0], sizes = [8, 32], strides = [1, 1]} : vector<8x128xf32> to vector<8x32xf32>
    %cst_24 = arith.constant dense<0.000000e+00> : vector<8x8xf32>
    %40 = tpu.matmul %37, %38, %cst_24 {dimension_numbers = #tpu.dot_dimension_numbers<[1], [1], [0], [0], [0, 0, 1, 0], [], []>} : vector<8x32xf32>, vector<8x32xf32>, vector<8x8xf32> -> vector<8x8xf32>
    %cst_25 = arith.constant -1.000000e+09 : f32
    %41 = vector.shape_cast %28 : vector<8x1xi1> to vector<8x1xi1>
    %42 = vector.broadcast %41 : vector<8x1xi1> to vector<8x8xi1>
    %43 = vector.broadcast %cst_25 : f32 to vector<8x8xf32>
    %44 = arith.select %42, %43, %40 : vector<8x8xi1>, vector<8x8xf32>
    %45 = arith.addf %44, %36 : vector<8x8xf32>
    %cst_26 = arith.constant dense<0xFF800000> : vector<8xf32>
    %46 = vector.multi_reduction <maximumf>, %45, %cst_26 [1] : vector<8x8xf32> to vector<8xf32>
    %47 = vector.shape_cast %46 : vector<8xf32> to vector<8x1xf32>
    %48 = vector.broadcast %47 : vector<8x1xf32> to vector<8x8xf32>
    %49 = arith.subf %45, %48 : vector<8x8xf32>
    %50 = math.exp %49 : vector<8x8xf32>
    %cst_27 = arith.constant dense<0.000000e+00> : vector<8xf32>
    %51 = vector.multi_reduction <add>, %50, %cst_27 [1] : vector<8x8xf32> to vector<8xf32>
    %52 = vector.shape_cast %51 : vector<8xf32> to vector<8x1xf32>
    %cst_28 = arith.constant dense<0.000000e+00> : vector<8x32xf32>
    %53 = tpu.matmul %50, %39, %cst_28 {dimension_numbers = #tpu.dot_dimension_numbers<[1], [0], [0], [1], [0, 0, 1, 1], [], []>} : vector<8x8xf32>, vector<8x32xf32>, vector<8x32xf32> -> vector<8x32xf32>
    %54 = tpu.reciprocal %52 {approx = true} : vector<8x1xf32> -> vector<8x1xf32>
    %55 = vector.broadcast %54 : vector<8x1xf32> to vector<8x32xf32>
    %56 = arith.mulf %53, %55 : vector<8x32xf32>
    %c0_29 = arith.constant 0 : index
    %c0_30 = arith.constant 0 : index
    %57 = vector.load %arg15[%c0_29, %c0_30] : memref<8x128xf32, #tpu.memory_space<vmem>>, vector<8x32xf32>
    tpu.vector_store %arg15[%c0_29, %c0_30], %56 {strides = array<i32>} : memref<8x128xf32, #tpu.memory_space<vmem>>, vector<8x32xf32>,
    %58 = vector.extract_strided_slice %16 {offsets = [0, 32], sizes = [8, 32], strides = [1, 1]} : vector<8x128xf32> to vector<8x32xf32>
    %59 = vector.extract_strided_slice %21 {offsets = [0, 32], sizes = [8, 32], strides = [1, 1]} : vector<8x128xf32> to vector<8x32xf32>
    %60 = vector.extract_strided_slice %26 {offsets = [0, 32], sizes = [8, 32], strides = [1, 1]} : vector<8x128xf32> to vector<8x32xf32>
    %cst_31 = arith.constant dense<0.000000e+00> : vector<8x8xf32>
    %61 = tpu.matmul %58, %59, %cst_31 {dimension_numbers = #tpu.dot_dimension_numbers<[1], [1], [0], [0], [0, 0, 1, 0], [], []>} : vector<8x32xf32>, vector<8x32xf32>, vector<8x8xf32> -> vector<8x8xf32>
    %cst_32 = arith.constant -1.000000e+09 : f32
    %62 = vector.shape_cast %28 : vector<8x1xi1> to vector<8x1xi1>
    %63 = vector.broadcast %62 : vector<8x1xi1> to vector<8x8xi1>
    %64 = vector.broadcast %cst_32 : f32 to vector<8x8xf32>
    %65 = arith.select %63, %64, %61 : vector<8x8xi1>, vector<8x8xf32>
    %66 = arith.addf %65, %36 : vector<8x8xf32>
    %cst_33 = arith.constant dense<0xFF800000> : vector<8xf32>
    %67 = vector.multi_reduction <maximumf>, %66, %cst_33 [1] : vector<8x8xf32> to vector<8xf32>
    %68 = vector.shape_cast %67 : vector<8xf32> to vector<8x1xf32>
    %69 = vector.broadcast %68 : vector<8x1xf32> to vector<8x8xf32>
    %70 = arith.subf %66, %69 : vector<8x8xf32>
    %71 = math.exp %70 : vector<8x8xf32>
    %cst_34 = arith.constant dense<0.000000e+00> : vector<8xf32>
    %72 = vector.multi_reduction <add>, %71, %cst_34 [1] : vector<8x8xf32> to vector<8xf32>
    %73 = vector.shape_cast %72 : vector<8xf32> to vector<8x1xf32>
    %cst_35 = arith.constant dense<0.000000e+00> : vector<8x32xf32>
    %74 = tpu.matmul %71, %60, %cst_35 {dimension_numbers = #tpu.dot_dimension_numbers<[1], [0], [0], [1], [0, 0, 1, 1], [], []>} : vector<8x8xf32>, vector<8x32xf32>, vector<8x32xf32> -> vector<8x32xf32>
    %75 = tpu.reciprocal %73 {approx = true} : vector<8x1xf32> -> vector<8x1xf32>
    %76 = vector.broadcast %75 : vector<8x1xf32> to vector<8x32xf32>
    %77 = arith.mulf %74, %76 : vector<8x32xf32>
    %c0_36 = arith.constant 0 : index
    %c32 = arith.constant 32 : index
    %78 = vector.load %arg15[%c0_36, %c32] : memref<8x128xf32, #tpu.memory_space<vmem>>, vector<8x32xf32>
    tpu.vector_store %arg15[%c0_36, %c32], %77 {strides = array<i32>} : memref<8x128xf32, #tpu.memory_space<vmem>>, vector<8x32xf32>,
    %79 = vector.extract_strided_slice %16 {offsets = [0, 64], sizes = [8, 32], strides = [1, 1]} : vector<8x128xf32> to vector<8x32xf32>
    %80 = vector.extract_strided_slice %21 {offsets = [0, 64], sizes = [8, 32], strides = [1, 1]} : vector<8x128xf32> to vector<8x32xf32>
    %81 = vector.extract_strided_slice %26 {offsets = [0, 64], sizes = [8, 32], strides = [1, 1]} : vector<8x128xf32> to vector<8x32xf32>
    %cst_37 = arith.constant dense<0.000000e+00> : vector<8x8xf32>
    %82 = tpu.matmul %79, %80, %cst_37 {dimension_numbers = #tpu.dot_dimension_numbers<[1], [1], [0], [0], [0, 0, 1, 0], [], []>} : vector<8x32xf32>, vector<8x32xf32>, vector<8x8xf32> -> vector<8x8xf32>
    %cst_38 = arith.constant -1.000000e+09 : f32
    %83 = vector.shape_cast %28 : vector<8x1xi1> to vector<8x1xi1>
    %84 = vector.broadcast %83 : vector<8x1xi1> to vector<8x8xi1>
    %85 = vector.broadcast %cst_38 : f32 to vector<8x8xf32>
    %86 = arith.select %84, %85, %82 : vector<8x8xi1>, vector<8x8xf32>
    %87 = arith.addf %86, %36 : vector<8x8xf32>
    %cst_39 = arith.constant dense<0xFF800000> : vector<8xf32>
    %88 = vector.multi_reduction <maximumf>, %87, %cst_39 [1] : vector<8x8xf32> to vector<8xf32>
    %89 = vector.shape_cast %88 : vector<8xf32> to vector<8x1xf32>
    %90 = vector.broadcast %89 : vector<8x1xf32> to vector<8x8xf32>
    %91 = arith.subf %87, %90 : vector<8x8xf32>
    %92 = math.exp %91 : vector<8x8xf32>
    %cst_40 = arith.constant dense<0.000000e+00> : vector<8xf32>
    %93 = vector.multi_reduction <add>, %92, %cst_40 [1] : vector<8x8xf32> to vector<8xf32>
    %94 = vector.shape_cast %93 : vector<8xf32> to vector<8x1xf32>
    %cst_41 = arith.constant dense<0.000000e+00> : vector<8x32xf32>
    %95 = tpu.matmul %92, %81, %cst_41 {dimension_numbers = #tpu.dot_dimension_numbers<[1], [0], [0], [1], [0, 0, 1, 1], [], []>} : vector<8x8xf32>, vector<8x32xf32>, vector<8x32xf32> -> vector<8x32xf32>
    %96 = tpu.reciprocal %94 {approx = true} : vector<8x1xf32> -> vector<8x1xf32>
    %97 = vector.broadcast %96 : vector<8x1xf32> to vector<8x32xf32>
    %98 = arith.mulf %95, %97 : vector<8x32xf32>
    %c0_42 = arith.constant 0 : index
    %c64 = arith.constant 64 : index
    %99 = vector.load %arg15[%c0_42, %c64] : memref<8x128xf32, #tpu.memory_space<vmem>>, vector<8x32xf32>
    tpu.vector_store %arg15[%c0_42, %c64], %98 {strides = array<i32>} : memref<8x128xf32, #tpu.memory_space<vmem>>, vector<8x32xf32>,
    %100 = vector.extract_strided_slice %16 {offsets = [0, 96], sizes = [8, 32], strides = [1, 1]} : vector<8x128xf32> to vector<8x32xf32>
    %101 = vector.extract_strided_slice %21 {offsets = [0, 96], sizes = [8, 32], strides = [1, 1]} : vector<8x128xf32> to vector<8x32xf32>
    %102 = vector.extract_strided_slice %26 {offsets = [0, 96], sizes = [8, 32], strides = [1, 1]} : vector<8x128xf32> to vector<8x32xf32>
    %cst_43 = arith.constant dense<0.000000e+00> : vector<8x8xf32>
    %103 = tpu.matmul %100, %101, %cst_43 {dimension_numbers = #tpu.dot_dimension_numbers<[1], [1], [0], [0], [0, 0, 1, 0], [], []>} : vector<8x32xf32>, vector<8x32xf32>, vector<8x8xf32> -> vector<8x8xf32>
    %cst_44 = arith.constant -1.000000e+09 : f32
    %104 = vector.shape_cast %28 : vector<8x1xi1> to vector<8x1xi1>
    %105 = vector.broadcast %104 : vector<8x1xi1> to vector<8x8xi1>
    %106 = vector.broadcast %cst_44 : f32 to vector<8x8xf32>
    %107 = arith.select %105, %106, %103 : vector<8x8xi1>, vector<8x8xf32>
    %108 = arith.addf %107, %36 : vector<8x8xf32>
    %cst_45 = arith.constant dense<0xFF800000> : vector<8xf32>
    %109 = vector.multi_reduction <maximumf>, %108, %cst_45 [1] : vector<8x8xf32> to vector<8xf32>
    %110 = vector.shape_cast %109 : vector<8xf32> to vector<8x1xf32>
    %111 = vector.broadcast %110 : vector<8x1xf32> to vector<8x8xf32>
    %112 = arith.subf %108, %111 : vector<8x8xf32>
    %113 = math.exp %112 : vector<8x8xf32>
    %cst_46 = arith.constant dense<0.000000e+00> : vector<8xf32>
    %114 = vector.multi_reduction <add>, %113, %cst_46 [1] : vector<8x8xf32> to vector<8xf32>
    %115 = vector.shape_cast %114 : vector<8xf32> to vector<8x1xf32>
    %cst_47 = arith.constant dense<0.000000e+00> : vector<8x32xf32>
    %116 = tpu.matmul %113, %102, %cst_47 {dimension_numbers = #tpu.dot_dimension_numbers<[1], [0], [0], [1], [0, 0, 1, 1], [], []>} : vector<8x8xf32>, vector<8x32xf32>, vector<8x32xf32> -> vector<8x32xf32>
    %117 = tpu.reciprocal %115 {approx = true} : vector<8x1xf32> -> vector<8x1xf32>
    %118 = vector.broadcast %117 : vector<8x1xf32> to vector<8x32xf32>
    %119 = arith.mulf %116, %118 : vector<8x32xf32>
    %c0_48 = arith.constant 0 : index
    %c96 = arith.constant 96 : index
    %120 = vector.load %arg15[%c0_48, %c96] : memref<8x128xf32, #tpu.memory_space<vmem>>, vector<8x32xf32>
    tpu.vector_store %arg15[%c0_48, %c96], %119 {strides = array<i32>} : memref<8x128xf32, #tpu.memory_space<vmem>>, vector<8x32xf32>,
    %c0_49 = arith.constant 0 : index
    %c0_50 = arith.constant 0 : index
    %121 = vector.load %arg15[%c0_49, %c0_50] : memref<8x128xf32, #tpu.memory_space<vmem>>, vector<8x128xf32>
    %c0_51 = arith.constant 0 : index
    %c0_52 = arith.constant 0 : index
    %122 = vector.load %arg10[%c0_51, %c0_52] : memref<128x128xf32, #tpu.memory_space<vmem>>, vector<128x128xf32>
    %cst_53 = arith.constant dense<0.000000e+00> : vector<8x128xf32>
    %123 = tpu.matmul %121, %122, %cst_53 {dimension_numbers = #tpu.dot_dimension_numbers<[1], [0], [0], [1], [0, 0, 1, 1], [], []>} : vector<8x128xf32>, vector<128x128xf32>, vector<8x128xf32> -> vector<8x128xf32>
    %c0_54 = arith.constant 0 : index
    %c0_55 = arith.constant 0 : index
    %124 = vector.load %arg11[%c0_54, %c0_55] : memref<1x128xf32, #tpu.memory_space<vmem>>, vector<1x128xf32>
    %125 = vector.broadcast %124 : vector<1x128xf32> to vector<8x128xf32>
    %126 = arith.addf %123, %125 : vector<8x128xf32>
    %127 = arith.addf %6, %126 : vector<8x128xf32>
    %cst_56 = arith.constant dense<0.000000e+00> : vector<8xf32>
    %128 = vector.multi_reduction <add>, %127, %cst_56 [1] : vector<8x128xf32> to vector<8xf32>
    %129 = vector.shape_cast %128 : vector<8xf32> to vector<8x1xf32>
    %cst_57 = arith.constant 1.280000e+02 : f32
    %130 = vector.broadcast %cst_57 : f32 to vector<8x1xf32>
    %131 = arith.divf %129, %130 : vector<8x1xf32>
    %132 = vector.broadcast %131 : vector<8x1xf32> to vector<8x128xf32>
    %133 = arith.subf %127, %132 : vector<8x128xf32>
    %134 = arith.mulf %133, %133 : vector<8x128xf32>
    %cst_58 = arith.constant dense<0.000000e+00> : vector<8xf32>
    %135 = vector.multi_reduction <add>, %134, %cst_58 [1] : vector<8x128xf32> to vector<8xf32>
    %136 = vector.shape_cast %135 : vector<8xf32> to vector<8x1xf32>
    %cst_59 = arith.constant 1.280000e+02 : f32
    %137 = vector.broadcast %cst_59 : f32 to vector<8x1xf32>
    %138 = arith.divf %136, %137 : vector<8x1xf32>
    %c0_60 = arith.constant 0 : index
    %c0_61 = arith.constant 0 : index
    %139 = vector.load %arg12[%c0_60, %c0_61] : memref<1x128xf32, #tpu.memory_space<vmem>>, vector<1x128xf32>
    %cst_62 = arith.constant 9.99999996E-13 : f32
    %140 = vector.broadcast %cst_62 : f32 to vector<8x1xf32>
    %141 = arith.addf %138, %140 : vector<8x1xf32>
    %142 = math.rsqrt %141 : vector<8x1xf32>
    %143 = vector.broadcast %142 : vector<8x1xf32> to vector<8x128xf32>
    %144 = arith.mulf %133, %143 : vector<8x128xf32>
    %145 = vector.broadcast %139 : vector<1x128xf32> to vector<8x128xf32>
    %146 = arith.mulf %145, %144 : vector<8x128xf32>
    %c0_63 = arith.constant 0 : index
    %c0_64 = arith.constant 0 : index
    %147 = vector.load %arg13[%c0_63, %c0_64] : memref<1x128xf32, #tpu.memory_space<vmem>>, vector<1x128xf32>
    %148 = vector.broadcast %147 : vector<1x128xf32> to vector<8x128xf32>
    %149 = arith.addf %146, %148 : vector<8x128xf32>
    %c0_65 = arith.constant 0 : index
    %c0_66 = arith.constant 0 : index
    %c0_67 = arith.constant 0 : index
    %150 = vector.load %arg14[%c0_65, %c0_66, %c0_67] : memref<1x8x128xf32, #tpu.memory_space<vmem>>, vector<1x8x128xf32>
    %151 = vector.shape_cast %150 : vector<1x8x128xf32> to vector<8x128xf32>
    %152 = vector.shape_cast %149 : vector<8x128xf32> to vector<1x8x128xf32>
    tpu.vector_store %arg14[%c0_65, %c0_66, %c0_67], %152 {strides = array<i32>} : memref<1x8x128xf32, #tpu.memory_space<vmem>>, vector<1x8x128xf32>,
    return
  }
  func.func @transform_0(%arg0: i32, %arg1: i32) -> (i32, i32, i32) {
    %c0_i32 = arith.constant 0 : i32
    %c0_i32_0 = arith.constant 0 : i32
    %c0_i32_1 = arith.constant 0 : i32
    return %arg0, %c0_i32, %c0_i32_0 : i32, i32, i32
  }
  func.func @transform_1(%arg0: i32, %arg1: i32) -> (i32, i32, i32) {
    %c0_i32 = arith.constant 0 : i32
    %c0_i32_0 = arith.constant 0 : i32
    %c0_i32_1 = arith.constant 0 : i32
    return %arg0, %c0_i32, %c0_i32_0 : i32, i32, i32
  }
  func.func @transform_2(%arg0: i32, %arg1: i32) -> (i32, i32) {
    %c0_i32 = arith.constant 0 : i32
    %c0_i32_0 = arith.constant 0 : i32
    %c0_i32_1 = arith.constant 0 : i32
    return %c0_i32, %c0_i32_0 : i32, i32
  }
  func.func @transform_3(%arg0: i32, %arg1: i32) -> (i32, i32) {
    %c0_i32 = arith.constant 0 : i32
    %c0_i32_0 = arith.constant 0 : i32
    %c0_i32_1 = arith.constant 0 : i32
    return %c0_i32, %c0_i32_0 : i32, i32
  }
  func.func @transform_4(%arg0: i32, %arg1: i32) -> (i32, i32) {
    %c0_i32 = arith.constant 0 : i32
    %c0_i32_0 = arith.constant 0 : i32
    %c0_i32_1 = arith.constant 0 : i32
    return %c0_i32, %c0_i32_0 : i32, i32
  }
  func.func @transform_5(%arg0: i32, %arg1: i32) -> (i32, i32) {
    %c0_i32 = arith.constant 0 : i32
    %c0_i32_0 = arith.constant 0 : i32
    %c0_i32_1 = arith.constant 0 : i32
    return %c0_i32, %c0_i32_0 : i32, i32
  }
  func.func @transform_6(%arg0: i32, %arg1: i32) -> (i32, i32) {
    %c0_i32 = arith.constant 0 : i32
    %c0_i32_0 = arith.constant 0 : i32
    %c0_i32_1 = arith.constant 0 : i32
    return %c0_i32, %c0_i32_0 : i32, i32
  }
  func.func @transform_7(%arg0: i32, %arg1: i32) -> (i32, i32) {
    %c0_i32 = arith.constant 0 : i32
    %c0_i32_0 = arith.constant 0 : i32
    %c0_i32_1 = arith.constant 0 : i32
    return %c0_i32, %c0_i32_0 : i32, i32
  }
  func.func @transform_8(%arg0: i32, %arg1: i32) -> (i32, i32) {
    %c0_i32 = arith.constant 0 : i32
    %c0_i32_0 = arith.constant 0 : i32
    %c0_i32_1 = arith.constant 0 : i32
    return %c0_i32, %c0_i32_0 : i32, i32
  }
  func.func @transform_9(%arg0: i32, %arg1: i32) -> (i32, i32) {
    %c0_i32 = arith.constant 0 : i32
    %c0_i32_0 = arith.constant 0 : i32
    %c0_i32_1 = arith.constant 0 : i32
    return %c0_i32, %c0_i32_0 : i32, i32
  }
  func.func @transform_10(%arg0: i32, %arg1: i32) -> (i32, i32) {
    %c0_i32 = arith.constant 0 : i32
    %c0_i32_0 = arith.constant 0 : i32
    %c0_i32_1 = arith.constant 0 : i32
    return %c0_i32, %c0_i32_0 : i32, i32
  }
  func.func @transform_11(%arg0: i32, %arg1: i32) -> (i32, i32) {
    %c0_i32 = arith.constant 0 : i32
    %c0_i32_0 = arith.constant 0 : i32
    %c0_i32_1 = arith.constant 0 : i32
    return %c0_i32, %c0_i32_0 : i32, i32
  }
  func.func @transform_12(%arg0: i32, %arg1: i32) -> (i32, i32, i32) {
    %c0_i32 = arith.constant 0 : i32
    %c0_i32_0 = arith.constant 0 : i32
    return %arg0, %arg1, %c0_i32 : i32, i32, i32
  }
}

</mosaic_0001>

<bundles_post_ra>
// kernel: tpu_custom_call.1
= control target key start
LH: loop header
LB: loop body
LE: loop exit
PB: predicated region body
PF: predicated region fallthrough
CT: control target
= control target key end

     0   :  { %s2947_s0 = inlined_call_operand.vmem [shape: f32[2,8,128], index: 0, kind: input, shape index: {}]   ;;  %s2948_s1 = inlined_call_operand.vmem [shape: f32[2,8,1], index: 1, kind: input, shape index: {}]   ;;  %s2949_s2 = inlined_call_operand.hbm [shape: f32[128,128], index: 2, kind: input, shape index: {}]   ;;  %s2950_s3 = inlined_call_operand.hbm [shape: f32[128,128], index: 3, kind: input, shape index: {}]   ;;  %s2951_s4 = inlined_call_operand.hbm [shape: f32[128,128], index: 4, kind: input, shape index: {}]   ;;  %s2952_s5 = inlined_call_operand.vmem [shape: f32[1,128], index: 5, kind: input, shape index: {}]   ;;  %s2953_s6 = inlined_call_operand.vmem [shape: f32[1,128], index: 6, kind: input, shape index: {}]   ;;  %s2954_s7 = inlined_call_operand.vmem [shape: f32[1,128], index: 7, kind: input, shape index: {}]   ;;  %s2955_s8 = inlined_call_operand.hbm [shape: f32[128,128], index: 8, kind: input, shape index: {}]   ;;  %s2956_s9 = inlined_call_operand.vmem [shape: f32[1,128], index: 9, kind: input, shape index: {}]   ;;  %s2957_s10 = inlined_call_operand.vmem [shape: f32[1,128], index: 10, kind: input, shape index: {}]   ;;  %s2958_s11 = inlined_call_operand.vmem [shape: f32[1,128], index: 11, kind: input, shape index: {}]   ;;  %s2959_s12 = inlined_call_operand.hbm [shape: f32[2,8,128], index: 12, kind: output, shape index: {}]  }
   0x1   :  { %2972 = sst [smem:[#allocation23_spill]] %s2950_s3 }
   0x2   :  { %2973 = sst [smem:[#allocation24_spill]] %s2957_s10 }
   0x3   :  { %2974 = sst [smem:[#allocation25_spill]] %s2958_s11 }
   0x4   :  { %2975 = sst [smem:[#allocation26_spill]] %s2959_s12 }
   0x5   :  { %17 = vsyncpa [#allocation4], 0 }
   0x6   :  { %18 = vsyncpa [#allocation7], 0 }
   0x7   :  { %19 = vsyncpa [#allocation10], 0 }
   0x8   :  { %20 = vsyncpa [#allocation5], 0 }
   0x9   :  { %22 = vsyncpa [#allocation5 + $0x1], 0  ;;  %s2553_s21 = smov 0   ;;  %s2555_s22 = smov 0  }
   0xa   :  { %s2557_s23 = smov 0   ;;  %s2559_s24 = smov 0  }
   0xb   :  { %s2561_s25 = smov 0   ;;  %s2563_s26 = smov 0  }
   0xc LB: > { %2976 = sst [smem:[#allocation16_spill]] %s2452_s21  ;;  %s1748_s27 = sadd.s32 4294967295, %s2472_s26   ;;  %s2472_s26 = sphi %s2563_s26, %s28_s26   ;;  %s2468_s25 = sphi %s2561_s25, %s3003_s25   ;;  %s2464_s24 = sphi %s2559_s24, %s3002_s24   ;;  %s2460_s23 = sphi %s2557_s23, %s3001_s23   ;;  %s2456_s22 = sphi %s2555_s22, %s3005_s22   ;;  %s2452_s21 = sphi %s2553_s21, %s3004_s21  }
   0xd   : > { %2977 = sst [smem:[#allocation17_spill]] %s2460_s23  ;;  %s1749_s28 = sadd.s32 4294967294, %s2472_s26  }
   0xe   : > { %2978 = sst [smem:[#allocation18_spill]] %s2468_s25  ;;  %s40_s29 = sadd.s32 1, %s2468_s25 }
   0xf   : > { %2979 = sst [smem:[#allocation19_spill]] %s2472_s26  ;;  %s311_s30 = sadd.s32 1, %s2460_s23 }
  0x10   : > { %p42_p0 = scmp.ge.s32.totalorder %s40_s29, 2  ;;  %p321_p1 = scmp.ne.s32.totalorder %s2460_s23, %s2456_s22 }
  0x11   : > { %p322_p2 = scmp.eq.s32.totalorder %s1748_s27, 1  ;;  %p327_p3 = scmp.ne.s32.totalorder %s2456_s22, %s2452_s21 }
  0x12   : > { %s3007_s29 = smov (%p42_p0, %s40_s29), 0  ;;  %p328_p5 = scmp.eq.s32.totalorder %s1749_s28, 1 }
  0x13   : > { %2980 = sst [smem:[#allocation20_spill]] %s3007_s29  ;;  %p2593_p4 = por %p322_p2, %p321_p1 }
  0x14   : > { %s306_s14 = ssub.s32 %s2468_s25, %s3007_s29  ;;  %p1750_p6 = scmp.ge.s32.totalorder %s2472_s26, 1 }
  0x15   : > { %s2981_s13 = scalar_select %p2593_p4, 1, 0 }
  0x16   : > { %p309_p7 = scmp.eq.s32.totalorder %s306_s14, 0  ;;  %p2600_p8 = por %p328_p5, %p327_p3 }
  0x17   : > { %p335_p9 = scmp.lt.s32.totalorder %s2472_s26, 3  ;;  %p2612_p11 = scmp.eq.s32.totalorder %s1748_s27, 0 }
  0x18   : > { %s2982_s15 = scalar_select %p2600_p8, 1, 0 }
  0x19   : > { %s2606_s16 = scalar_select %p309_p7, %s2460_s23, %s311_s30  }
  0x1a   : > { %2983 = sst [smem:[#allocation21_spill]] %s2982_s15  ;;  %p2608_p10 = pnand %p1750_p6, %p335_p9 }
  0x1b   : > { %2984 = sst [smem:[#allocation22_spill]] %s2606_s16  ;;  %s2474_s19 = smov [#allocation6]  }
  0x1c   : > { %s2985_s17 = scalar_select %p2608_p10, 1, 0 }
  0x1d   : > { %s2986_s18 = scalar_select %p2612_p11, 1, 0 }
  0x1e   : > { %p2164_p12 = pneg %p2608_p10  ;;  %s360_s20 = sshll.u32 %s2474_s19, 4  ;;  %s361_s20 = int_to_ptr.vmem [resolvable:$true] %s360_s20 }
  0x1f   : > { %s2475_s30 = smov [#allocation3]   ;;  %s2988_s3 = sld [smem:[#allocation23_spill]] }
  0x20   : > { %p2620_p13 = pnand %p2612_p11, %p2164_p12  ;;  %s347_s14 = sshll.u32 %s2475_s30, 4  ;;  %s348_s14 = int_to_ptr.vmem [resolvable:$true] %s347_s14 }
  0x22   : > { %p2632_p1 = pneg %p2620_p13 }
  0x25   : > { %s2270_s27 = scalar_lea.hbm %s2988_s3, 2048 }
  0x26   : > { %p2271_p0 = scmp.ne.s32.totalorder %s2988_s3, %s2270_s27  ;;  %p2277_p5 = scmp.lt.u32.totalorder %s2270_s27, %s2988_s3 }
  0x28   : > { %p2273_p2 = pnand %p2632_p1, %p2271_p0 }
  0x2a   : > { %p2274_p3 = pneg %p2273_p2 }
  0x2c   : > { %p2279_p6 = pnand %p2277_p5, %p2274_p3 }
  0x2e   : > { %2282 = shalt.err (!%p2279_p6)
}
  0x2f   : > { %s2283_s25 = scalar_lea.vmem %s361_s20, 2048  ;;  %p2291_p8 = scmp.lt.s32.totalorder %s361_s20, %s361_s20 }
  0x30   : > { %p2284_p7 = scmp.ne.s32.totalorder %s361_s20, %s2283_s25  ;;  %p2292_p4 = scmp.lt.s32.totalorder %s2283_s25, %s2283_s25 }
  0x32   : > { %p2286_p9 = pnand %p2284_p7, %p2632_p1  ;;  %p2293_p11 = por %p2292_p4, %p2291_p8 }
  0x34   : > { %p2287_p12 = pneg %p2286_p9 }
  0x36   : > { %p2294_p10 = pnand %p2293_p11, %p2287_p12 }
  0x38   : > { %2297 = shalt.err (!%p2294_p10)
}
  0x39   : > { %s2476_s23 = smov 128   ;;  %s2477_s29 = smov 8  }
  0x3a   : > { %2170 = dma.hbm_to_vmem [thread:$0]  (!%p2620_p13), %s2988_s3, 2048, %s361_s20, [#allocation7], %s2476_s23, %s2476_s23, %s2477_s29  }
  0x3b   : > { %s2298_s27 = scalar_lea.hbm %s2949_s2, 2048 }
  0x3c   : > { %p2299_p4 = scmp.ne.s32.totalorder %s2949_s2, %s2298_s27  ;;  %p2305_p11 = scmp.lt.u32.totalorder %s2298_s27, %s2949_s2 }
  0x3e   : > { %p2301_p8 = pnand %p2299_p4, %p2632_p1 }
  0x40   : > { %p2302_p10 = pneg %p2301_p8 }
  0x42   : > { %p2307_p0 = pnand %p2305_p11, %p2302_p10 }
  0x44   : > { %2310 = shalt.err (!%p2307_p0)
}
  0x45   : > { %s2311_s21 = scalar_lea.vmem %s348_s14, 2048  ;;  %p2319_p6 = scmp.lt.s32.totalorder %s348_s14, %s348_s14 }
  0x46   : > { %p2312_p2 = scmp.ne.s32.totalorder %s348_s14, %s2311_s21  ;;  %p2320_p7 = scmp.lt.s32.totalorder %s2311_s21, %s2311_s21 }
  0x48   : > { %p2314_p3 = pnand %p2312_p2, %p2632_p1  ;;  %p2321_p9 = por %p2320_p7, %p2319_p6 }
  0x4a   : > { %p2315_p5 = pneg %p2314_p3 }
  0x4c   : > { %p2322_p12 = pnand %p2321_p9, %p2315_p5 }
  0x4e   : > { %2325 = shalt.err (!%p2322_p12)
}
  0x4f   : > { %2167 = dma.hbm_to_vmem [thread:$0]  (!%p2620_p13), %s2949_s2, 2048, %s348_s14, [#allocation4], %s2476_s23, %s2476_s23, %s2477_s29  }
  0x50   : > { %s2478_s26 = smov [#allocation8]   ;;  %s2479_s15 = smov [#allocation9]  }
  0x51   : > { %s373_s20 = sshll.u32 %s2478_s26, 4  ;;  %s395_s16 = sshll.u32 %s2479_s15, 4  ;;  %s374_s20 = int_to_ptr.vmem [resolvable:$true] %s373_s20  ;;  %s396_s16 = int_to_ptr.vmem [resolvable:$true] %s395_s16 }
  0x52   : > { %s2326_s25 = scalar_lea.hbm %s2951_s4, 2048 }
  0x53   : > { %p2327_p4 = scmp.ne.s32.totalorder %s2951_s4, %s2326_s25  ;;  %p2333_p11 = scmp.lt.u32.totalorder %s2326_s25, %s2951_s4 }
  0x55   : > { %p2329_p8 = pnand %p2327_p4, %p2632_p1 }
  0x57   : > { %p2330_p10 = pneg %p2329_p8 }
  0x59   : > { %p2335_p0 = pnand %p2333_p11, %p2330_p10 }
  0x5b   : > { %2338 = shalt.err (!%p2335_p0)
}
  0x5c   : > { %s2339_s14 = scalar_lea.vmem %s374_s20, 2048  ;;  %p2347_p6 = scmp.lt.s32.totalorder %s374_s20, %s374_s20 }
  0x5d   : > { %p2340_p2 = scmp.ne.s32.totalorder %s374_s20, %s2339_s14  ;;  %p2348_p7 = scmp.lt.s32.totalorder %s2339_s14, %s2339_s14 }
  0x5f   : > { %p2342_p3 = pnand %p2340_p2, %p2632_p1  ;;  %p2349_p9 = por %p2348_p7, %p2347_p6 }
  0x61   : > { %p2343_p5 = pneg %p2342_p3 }
  0x63   : > { %p2350_p12 = pnand %p2349_p9, %p2343_p5 }
  0x65   : > { %2353 = shalt.err (!%p2350_p12)
}
  0x66   : > { %2173 = dma.hbm_to_vmem [thread:$0]  (!%p2620_p13), %s2951_s4, 2048, %s374_s20, [#allocation7], %s2476_s23, %s2476_s23, %s2477_s29  }
  0x67   : > { %s2354_s15 = scalar_lea.hbm %s2955_s8, 2048 }
  0x68   : > { %p2355_p4 = scmp.ne.s32.totalorder %s2955_s8, %s2354_s15  ;;  %p2361_p11 = scmp.lt.u32.totalorder %s2354_s15, %s2955_s8 }
  0x6a   : > { %p2357_p8 = pnand %p2355_p4, %p2632_p1 }
  0x6c   : > { %p2358_p10 = pneg %p2357_p8 }
  0x6e   : > { %p2363_p0 = pnand %p2361_p11, %p2358_p10 }
  0x70   : > { %2366 = shalt.err (!%p2363_p0)
}
  0x71   : > { %s2367_s11 = scalar_lea.vmem %s396_s16, 2048  ;;  %p2375_p6 = scmp.lt.s32.totalorder %s396_s16, %s396_s16 }
  0x72   : > { %p2368_p2 = scmp.ne.s32.totalorder %s396_s16, %s2367_s11  ;;  %p2376_p7 = scmp.lt.s32.totalorder %s2367_s11, %s2367_s11 }
  0x74   : > { %p2370_p3 = pnand %p2368_p2, %p2632_p1  ;;  %p2377_p9 = por %p2376_p7, %p2375_p6 }
  0x76   : > { %p2371_p5 = pneg %p2370_p3 }
  0x78   : > { %p2378_p12 = pnand %p2377_p9, %p2371_p5 }
  0x7a   : > { %2381 = shalt.err (!%p2378_p12)
}
  0x7b   : > { %2176 = dma.hbm_to_vmem [thread:$0]  (!%p2620_p13), %s2955_s8, 2048, %s396_s16, [#allocation10], %s2476_s23, %s2476_s23, %s2477_s29  }
  0x7c   : > { %p2990_p4 = scmp.ne.s32.totalorder %s2985_s17, 0 }
  0x7d   : > { %p2991_p1 = scmp.ne.s32.totalorder (!%p2990_p4), %s2986_s18, 0 }
  0x7e   : > { %434 = sbr.rel (%p2990_p4) target bundleno = 2772 (0xad4), region = 68 }
  0x85   : > { %2435 = dma.done.wait (%p2991_p1), [#allocation4], 2048  }
  0x86   : > { %2437 = vsyncadd (%p2991_p1), [#allocation4], 4294965248 }
  0x87   : > { %2439 = dma.done.wait (%p2991_p1), [#allocation7], 4096  }
  0x88   : > { %2441 = vsyncadd (%p2991_p1), [#allocation7], 4294963200 }
  0x89   : > { %2443 = dma.done.wait (%p2991_p1), [#allocation10], 2048  }
  0x8a   : > { %2445 = vsyncadd (%p2991_p1), [#allocation10], 4294965248  ;;  %v2480_v0 = vmov 0.0|0.0   ;;  %vm2481_vm0 = vmmov 0   ;;  %v2482_v1 = vmov 0.0   ;;  %v599_v2 = vld [vmem:[#allocation6] sm:$0xff] }
  0x8b   : > { %2074 = vmatprep.subr.bf16.mxu1 %v2480_v0  ;;  %2050 = vmatprep.subr.bf16.mxu0 %v2480_v0  ;;  %v600_v3 = vld [vmem:[#allocation6 + $0x8] sm:$0xff]  ;;  %v505_v4 = vld [vmem:[#allocation3] sm:$0xff]  ;;  %v601_v7 = vld [vmem:[#allocation6 + $0x10] sm:$0xff]  ;;  %p491_p13 = scmp.lt.s32.totalorder %s2464_s24, 1  ;;  %v2483_v63 = vmov 0   ;;  %vm794_vm2 = vcmask 261120  }
  0x8c   : > { %1937 = vmatprep.mubr.msk.f32.mxu1 %vm2481_vm0, %v2482_v1  ;;  %1902 = vmatprep.mubr.msk.f32.mxu0 %vm2481_vm0, %v2482_v1  ;;  %v2075_v5 = vpack.c.bf16 %v600_v3, %v599_v2  ;;  %v506_v6 = vld [vmem:[#allocation3 + $0x8] sm:$0xff]  ;;  %v602_v8 = vld [vmem:[#allocation6 + $0x18] sm:$0xff]  ;;  %v507_v10 = vld [vmem:[#allocation3 + $0x10] sm:$0xff]  ;;  %s2484_s30 = smov 96   ;;  %vm878_vm5 = vcmask 64512   ;;  %s2485_s21 = smov 64  }
  0x8d   : > { %v2051_v9 = vpack.c.bf16 %v506_v6, %v505_v4  ;;  %v508_v11 = vld [vmem:[#allocation3 + $0x18] sm:$0xff]  ;;  %v2078_v12 = vpack.c.bf16 %v602_v8, %v601_v7  ;;  %v603_v14 = vld [vmem:[#allocation6 + $0x20] sm:$0xff]  ;;  %v604_v15 = vld [vmem:[#allocation6 + $0x28] sm:$0xff]  ;;  %s2746_s17 = scalar_select %p491_p13, %s2464_s24, 1  ;;  %2251 = vset.pattern.permute.xlu0 %v2483_v63  ;;  %vm1136_vm6 = vcmask 523520   ;;  %vm1309_vm7 = vcmask 785920  }
  0x8e   : > { %2076 = vmatpush3.bf16.msra.mxu1 %v2075_v5  ;;  %v2054_v13 = vpack.c.bf16 %v508_v11, %v507_v10  ;;  %v509_v16 = vld [vmem:[#allocation3 + $0x20] sm:$0xff]  ;;  %v510_v17 = vld [vmem:[#allocation3 + $0x28] sm:$0xff]  ;;  %v2081_v18 = vpack.c.bf16 %v604_v15, %v603_v14  ;;  %v605_v20 = vld [vmem:[#allocation6 + $0x30] sm:$0xff]  ;;  %s2486_s11 = smov 32   ;;  %vm1482_vm8 = vcmask 1048320   ;;  %s1783_s10 = sshll.u32 %s2464_s24, 7 }
  0x8f   : > { %2052 = vmatpush3.bf16.msra.mxu0 %v2051_v9  ;;  %2077 = vmatprep.subr.bf16.mxu1 %v2480_v0  ;;  %v2057_v19 = vpack.c.bf16 %v510_v17, %v509_v16  ;;  %v606_v21 = vld [vmem:[#allocation6 + $0x38] sm:$0xff]  ;;  %v511_v22 = vld [vmem:[#allocation3 + $0x30] sm:$0xff]  ;;  %v607_v26 = vld [vmem:[#allocation6 + $0x40] sm:$0xff]  ;;  %s1762_s18 = sshll.u32 %s2746_s17, 3  ;;  %s488_s17 = sand.u32 1, %s2456_s22  }
  0x90   : > { %2053 = vmatprep.subr.bf16.mxu0 %v2480_v0  ;;  %v512_v23 = vld [vmem:[#allocation3 + $0x38] sm:$0xff]  ;;  %v2084_v24 = vpack.c.bf16 %v606_v21, %v605_v20  ;;  %v608_v27 = vld [vmem:[#allocation6 + $0x48] sm:$0xff]  ;;  %v513_v28 = vld [vmem:[#allocation3 + $0x40] sm:$0xff]  ;;  %s494_s23 = scalar_lea.vmem %s2947_s0, %s1762_s18  ;;  %s498_s3 = scalar_lea.vmem %s2948_s1, %s1762_s18 }
  0x91   : > { %v2060_v25 = vpack.c.bf16 %v512_v23, %v511_v22  ;;  %v514_v29 = vld [vmem:[#allocation3 + $0x48] sm:$0xff]  ;;  %v2087_v30 = vpack.c.bf16 %v608_v27, %v607_v26  ;;  %v609_v32 = vld [vmem:[#allocation6 + $0x50] sm:$0xff]  ;;  %v610_v33 = vld [vmem:[#allocation6 + $0x58] sm:$0xff]  ;;  %s1761_s18 = sshll.u32 %s488_s17, 3  ;;  %s2994_s27 = sld [smem:[#allocation26_spill]] }
  0x92   : > { %2079 = vmatpush3.bf16.msra.mxu1 %v2078_v12  ;;  %v2063_v31 = vpack.c.bf16 %v514_v29, %v513_v28  ;;  %v515_v34 = vld [vmem:[#allocation3 + $0x50] sm:$0xff]  ;;  %v516_v35 = vld [vmem:[#allocation3 + $0x58] sm:$0xff]  ;;  %v2090_v36 = vpack.c.bf16 %v610_v33, %v609_v32  ;;  %v611_v38 = vld [vmem:[#allocation6 + $0x60] sm:$0xff]  ;;  %v786_v29 = vlaneseq  ;;  %s490_s12 = scalar_lea.vmem [#allocation11], %s1761_s18  ;;  %p2995_p10 = scmp.ne.s32.totalorder %s2981_s13, 0 }
  0x93   : > { %2055 = vmatpush3.bf16.msra.mxu0 %v2054_v13  ;;  %2080 = vmatprep.subr.bf16.mxu1 %v2480_v0  ;;  %v2066_v37 = vpack.c.bf16 %v516_v35, %v515_v34  ;;  %v612_v39 = vld [vmem:[#allocation6 + $0x68] sm:$0xff]  ;;  %v517_v40 = vld [vmem:[#allocation3 + $0x60] sm:$0xff]  ;;  %v613_v44 = vld [vmem:[#allocation6 + $0x70] sm:$0xff]  ;;  %s1623_s26 = sshll.u32 %s490_s12, 4  ;;  %s2487_s24 = smov [#allocation11]   ;;  %s2902_s26 = int_to_ptr.vmem [resolvable:$true] %s1623_s26 }
  0x94   : > { %2056 = vmatprep.subr.bf16.mxu0 %v2480_v0  ;;  %v518_v41 = vld [vmem:[#allocation3 + $0x68] sm:$0xff]  ;;  %v2093_v42 = vpack.c.bf16 %v612_v39, %v611_v38  ;;  %v614_v45 = vld [vmem:[#allocation6 + $0x78] sm:$0xff]  ;;  %v519_v46 = vld [vmem:[#allocation3 + $0x70] sm:$0xff]  ;;  %s2386_s20 = sshll.u32 %s2487_s24, 4  ;;  %s2387_s20 = int_to_ptr.vmem [resolvable:$false] %s2386_s20 }
  0x95   : > { %v2069_v43 = vpack.c.bf16 %v518_v41, %v517_v40  ;;  %v520_v47 = vld [vmem:[#allocation3 + $0x78] sm:$0xff]  ;;  %v2096_v48 = vpack.c.bf16 %v614_v45, %v613_v44  ;;  %v692_v50 = vld [vmem:[#allocation8] sm:$0xff]  ;;  %v693_v51 = vld [vmem:[#allocation8 + $0x8] sm:$0xff]  ;;  %s2388_s14 = scalar_lea.vmem %s2387_s20, 256  ;;  %p2389_p2 = scmp.lt.s32.totalorder %s2902_s26, %s2387_s20 }
  0x96   : > { %2082 = vmatpush3.bf16.msra.mxu1 %v2081_v18  ;;  %v2072_v49 = vpack.c.bf16 %v520_v47, %v519_v46  ;;  %v2758_v52 = vld [vmem:[%s494_s23] sm:$0xff]  ;;  %v2099_v53 = vpack.c.bf16 %v693_v51, %v692_v50  ;;  %v694_v54 = vld [vmem:[#allocation8 + $0x10] sm:$0xff]  ;;  %v696_v57 = vld [vmem:[#allocation8 + $0x20] sm:$0xff]  ;;  %s2992_s23 = sld [smem:[#allocation24_spill]] }
  0x97   : > { %2058 = vmatpush3.bf16.msra.mxu0 %v2057_v19  ;;  %2083 = vmatprep.subr.bf16.mxu1 %v2480_v0  ;;  %v695_v55 = vld [vmem:[#allocation8 + $0x18] sm:$0xff]  ;;  %v697_v58 = vld [vmem:[#allocation8 + $0x28] sm:$0xff]  ;;  %v698_v60 = vld [vmem:[#allocation8 + $0x30] sm:$0xff]  ;;  %s2900_s25 = scalar_lea.hbm %s2994_s27, %s1783_s10 }
  0x98   : > { %2059 = vmatprep.subr.bf16.mxu0 %v2480_v0  ;;  %v2102_v56 = vpack.c.bf16 %v695_v55, %v694_v54  ;;  %v2105_v59 = vpack.c.bf16 %v697_v58, %v696_v57  ;;  %v699_v61 = vld [vmem:[#allocation8 + $0x38] sm:$0xff]  ;;  %v700_v2 = vld [vmem:[#allocation8 + $0x40] sm:$0xff]  ;;  %v701_v3 = vld [vmem:[#allocation8 + $0x48] sm:$0xff] }
  0x99   : > { %v2108_v62 = vpack.c.bf16 %v699_v61, %v698_v60  ;;  %v504_v4 = vld [vmem:[%s498_s3] sm:$0xff]  ;;  %v2111_v5 = vpack.c.bf16 %v701_v3, %v700_v2  ;;  %v702_v7 = vld [vmem:[#allocation8 + $0x50] sm:$0xff]  ;;  %v704_v10 = vld [vmem:[#allocation8 + $0x60] sm:$0xff]  ;;  %s2993_s3 = sld [smem:[#allocation25_spill]] }
  0x9a   : > { %2085 = vmatpush3.bf16.msra.mxu1 %v2084_v24  ;;  %vm785_vm1 = vcmp.eq.f32.partialorder %v504_v4, 0.0  ;;  %v703_v8 = vld [vmem:[#allocation8 + $0x58] sm:$0xff]  ;;  %v705_v11 = vld [vmem:[#allocation8 + $0x68] sm:$0xff]  ;;  %v706_v13 = vld [vmem:[#allocation8 + $0x70] sm:$0xff] }
  0x9b   : > { %2061 = vmatpush3.bf16.msra.mxu0 %v2060_v25  ;;  %2086 = vmatprep.subr.bf16.mxu1 %v2480_v0  ;;  %v871_v6 = vsel %vm785_vm1, 1, %v2483_v63  ;;  %v2114_v9 = vpack.c.bf16 %v703_v8, %v702_v7  ;;  %v2117_v12 = vpack.c.bf16 %v705_v11, %v704_v10  ;;  %v707_v14 = vld [vmem:[#allocation8 + $0x78] sm:$0xff] }
  0x9c   : > { %2062 = vmatprep.subr.bf16.mxu0 %v2480_v0  ;;  %873 = vperm.xlu0 %2251, %v871_v6   ;;  %v2120_v15 = vpack.c.bf16 %v707_v14, %v706_v13  ;;  %v1765_v16 = vld [vmem:[%s2953_s6] ss:$0 sm:$0xff] }
  0x9d   : > { %v1764_v17 = vld [vmem:[%s2952_s5] ss:$0 sm:$0xff] }
  0x9e   : > { %2088 = vmatpush3.bf16.msra.mxu1 %v2087_v30  ;;  %v1766_v25 = vld [vmem:[%s2954_s7] ss:$0 sm:$0xff]  ;;  %v787_v30 = vshrl.u32 %v786_v29, 7 }
  0x9f   : > { %2064 = vmatpush3.bf16.msra.mxu0 %v2063_v31  ;;  %2089 = vmatprep.subr.bf16.mxu1 %v2480_v0  ;;  %v791_v31 = vand.u32 127, %v786_v29 }
  0xa0   : > { %2065 = vmatprep.subr.bf16.mxu0 %v2480_v0 }
  0xa1   : > { %vm792_vm3 = vcmp.gt.s32.totalorder %v791_v31, %v787_v30 }
  0xa2   : > { %2091 = vmatpush3.bf16.msra.mxu1 %v2090_v36  ;;  %v2808_v33 = vsel %vm792_vm3, -inf, %v2482_v1 }
  0xa3   : > { %2067 = vmatpush3.bf16.msra.mxu0 %v2066_v37  ;;  %2092 = vmatprep.subr.bf16.mxu1 %v2480_v0 }
  0xa4   : > { %2068 = vmatprep.subr.bf16.mxu0 %v2480_v0 }
  0xa6   : > { %2094 = vmatpush3.bf16.msra.mxu1 %v2093_v42 }
  0xa7   : > { %2070 = vmatpush3.bf16.msra.mxu0 %v2069_v43  ;;  %2095 = vmatprep.subr.bf16.mxu1 %v2480_v0 }
  0xa8   : > { %2071 = vmatprep.subr.bf16.mxu0 %v2480_v0 }
  0xaa   : > { %2097 = vmatpush3.bf16.msra.mxu1 %v2096_v48 }
  0xab   : > { %2073 = vmatpush3.bf16.msra.mxu0 %v2072_v49  ;;  %1975 = vmatprep.subr.mxu1 %v2482_v1 }
  0xac   : > { %2098 = vmatprep.subr.bf16.mxu0 %v2480_v0 }
  0xad   : > { %1938 = vmatmul.mubr.f32.vlgmr.msra.gmra.mrb[0].mxu1 %v2758_v52 }
  0xae   : > { %1903 = vmatmul.mubr.f32.vlgmr.msra.gmra.mrb[0].mxu0 %v2758_v52  ;;  %1977 = vmatprep.mubr.msk.f32.mxu1 %vm2481_vm0, %v2482_v1 }
  0xaf   : > { %2100 = vmatpush3.bf16.msra.mxu0 %v2099_v53  ;;  %1972 = vmatprep.mubr.msk.f32.mxu0 %vm2481_vm0, %v2482_v1 }
  0xb0   : > { %2101 = vmatprep.subr.bf16.mxu0 %v2480_v0 }
  0xb3   : > { %2103 = vmatpush3.bf16.msra.mxu0 %v2102_v56 }
  0xb4   : > { %2104 = vmatprep.subr.bf16.mxu0 %v2480_v0 }
  0xb7   : > { %2106 = vmatpush3.bf16.msra.mxu0 %v2105_v59 }
  0xb8   : > { %2107 = vmatprep.subr.bf16.mxu0 %v2480_v0 }
  0xbb   : > { %2109 = vmatpush3.bf16.msra.mxu0 %v2108_v62 }
  0xbc   : > { %2110 = vmatprep.subr.bf16.mxu0 %v2480_v0 }
  0xbf   : > { %2112 = vmatpush3.bf16.msra.mxu0 %v2111_v5 }
  0xc0   : > { %2113 = vmatprep.subr.bf16.mxu0 %v2480_v0 }
  0xc3   : > { %2115 = vmatpush3.bf16.msra.mxu0 %v2114_v9 }
  0xc4   : > { %2116 = vmatprep.subr.bf16.mxu0 %v2480_v0 }
  0xc7   : > { %2118 = vmatpush3.bf16.msra.mxu0 %v2117_v12 }
  0xc8   : > { %2119 = vmatprep.subr.bf16.mxu0 %v2480_v0 }
  0xcb   : > { %2121 = vmatpush3.bf16.msra.mxu0 %v2120_v15 }
  0xcc   : > { %2122 = vmatprep.subr.bf16.mxu0 %v2480_v0 }
  0xce   : > { %1973 = vmatmul.mubr.f32.vlgmr.msra.gmra.mrb[2].mxu0 %v2758_v52 }
  0xcf   : > { %2047 = vmatprep.mubr.msk.f32.mxu0 %vm2481_vm0, %v2482_v1 }
 0x11b   : > { %v2804_v32 = vpop.permute.xlu0 %873 }
 0x11c   : > { %vm875_vm4 = vcmp.eq.s32.totalorder %v2804_v32, 1 }
 0x180   : > { %v688_v18 = vpop.f32.mrb[0].mxu1 }
 0x181   : > { %v689_v19 = vadd.f32 %v1765_v16, %v688_v18  ;;  %v594_v20 = vpop.f32.mrb[0].mxu0  ;;  %v1939_v21 = vpop.f32.mrb[1].mxu1 }
 0x182   : > { %v595_v22 = vadd.f32 %v1764_v17, %v594_v20  ;;  %v1904_v23 = vpop.f32.mrb[1].mxu0 }
 0x183   : > { %966 = vrot.lane.b32.xlu1 %v689_v19, %s2484_s30  ;;  %1976 = vmatpush3.xpose.msk.msra.mxu1 %vm794_vm2, %v689_v19 }
 0x184   : > { %v598_v24 = vmul.f32 0.17677669, %v595_v22  ;;  %1980 = vmatprep.subr.mxu1 %v2482_v1 }
 0x186   : > { %1978 = vmatmul.mubr.msk.f32.vlgmr.msra.gmra.mrb[2].mxu1 %vm794_vm2, %v598_v24 }
 0x187   : > { %964 = vrot.lane.b32.xlu1 %v598_v24, %s2484_s30  ;;  %1982 = vmatprep.mubr.msk.f32.mxu1 %vm2481_vm0, %v2482_v1 }
 0x1a1   : > { %v781_v26 = vpop.f32.mrb[2].mxu0 }
 0x1a2   : > { %v2800_v27 = vadd.f32 %v1766_v25, %v781_v26  ;;  %v1974_v28 = vpop.f32.mrb[3].mxu0 }
 0x1a4   : > { %1981 = vmatpush3.msra.mxu1 %v2800_v27 }
 0x1a5   : > { %1985 = vmatprep.subr.mxu1 %v2482_v1 }
 0x1f5   : > { %v967_v42 = vpop.permute.xlu1 %966 }
 0x1f9   : > { %v965_v44 = vpop.permute.xlu1 %964 }
 0x259   : > { %v867_v34 = vpop.f32.mrb[2].mxu1 }
 0x25a   : > { %v876_v35 = vsel %vm875_vm4, -1e+09, %v867_v34  ;;  %v1979_v36 = vpop.f32.mrb[3].mxu1 }
 0x25b   : > { %v877_v37 = vadd.f32 %v876_v35, %v2808_v33  ;;  %v1485_v36 = vld [vmem:[#allocation9] sm:$0xff] }
 0x25d   : > { %v879_v38 = vsel %vm878_vm5, %v877_v37, -inf }
 0x25e   : > { %880 = vmax.xlane.f32.xlu0 %v879_v38  ;;  %v1487_v38 = vld [vmem:[#allocation9 + $0x10] sm:$0xff] }
 0x274   : > { %1054 = vrot.lane.b32.xlu0 %v2800_v27, %s2484_s30 }
 0x278   : > { %1138 = vrot.lane.b32.xlu0 %v598_v24, %s2485_s21 }
 0x2eb   : > { %v881_v39 = vpop.xlane.xlu0 %880 }
 0x2ec   : > { %v882_v40 = vsub.f32 %v877_v37, %v881_v39  ;;  %v1486_v37 = vld [vmem:[#allocation9 + $0x8] sm:$0xff] }
 0x2ed   : > { %v2123_v39 = vpack.c.bf16 %v1486_v37, %v1485_v36 }
 0x2ee   : > { %v883_v41 = vmul.f32 1.442695, %v882_v40  ;;  %v1488_v40 = vld [vmem:[#allocation9 + $0x18] sm:$0xff] }
 0x2ef   : > { %v1055_v45 = vpop.permute.xlu0 %1054  ;;  %2124 = vmatpush3.bf16.msra.mxu0 %v2123_v39 }
 0x2f0   : > { %2252 = vpow2.f32 %v883_v41  ;;  %v2126_v41 = vpack.c.bf16 %v1488_v40, %v1487_v38  ;;  %2125 = vmatprep.subr.bf16.mxu0 %v2480_v0 }
 0x2f3   : > { %v1139_v59 = vpop.permute.xlu0 %1138  ;;  %2127 = vmatpush3.bf16.msra.mxu0 %v2126_v41 }
 0x2f4   : > { %2128 = vmatprep.subr.bf16.mxu0 %v2480_v0 }
 0x2fa   : > { %v2817_v43 = vpop.eup %2252 }
 0x2fb   : > { %1983 = vmatmul.mubr.msk.f32.vlgmr.msra.gmra.mrb[4].mxu1 %vm878_vm5, %v2817_v43 }
 0x2fc   : > { %1986 = vmatpush3.xpose.msk.msra.mxu1 %vm794_vm2, %v967_v42  ;;  %1987 = vmatprep.mubr.msk.f32.mxu1 %vm2481_vm0, %v2482_v1  ;;  %v1489_v42 = vld [vmem:[#allocation9 + $0x20] sm:$0xff] }
 0x2fd   : > { %1990 = vmatprep.subr.mxu1 %v2482_v1 }
 0x2ff   : > { %1988 = vmatmul.mubr.msk.f32.vlgmr.msra.gmra.mrb[6].mxu1 %vm794_vm2, %v965_v44 }
 0x300   : > { %1991 = vmatpush3.msra.mxu1 %v1055_v45  ;;  %1992 = vmatprep.mubr.msk.f32.mxu1 %vm2481_vm0, %v2482_v1  ;;  %v1491_v45 = vld [vmem:[#allocation9 + $0x30] sm:$0xff] }
 0x301   : > { %1995 = vmatprep.subr.mxu1 %v2482_v1 }
 0x3ce   : > { %v2829_v46 = vpop.f32.mrb[4].mxu1 }
 0x3cf   : > { %v1984_v47 = vpop.f32.mrb[5].mxu1 }
 0x3d0   : > { %v1492_v47 = vld [vmem:[#allocation9 + $0x38] sm:$0xff] }
 0x3d2   : > { %v1038_v48 = vpop.f32.mrb[6].mxu1 }
 0x3d3   : > { %v1042_v49 = vsel %vm875_vm4, -1e+09, %v1038_v48  ;;  %v1989_v50 = vpop.f32.mrb[7].mxu1  ;;  %v1493_v48 = vld [vmem:[#allocation9 + $0x40] sm:$0xff] }
 0x3d4   : > { %v1043_v51 = vadd.f32 %v1042_v49, %v2808_v33  ;;  %v1494_v49 = vld [vmem:[#allocation9 + $0x48] sm:$0xff] }
 0x3d5   : > { %v2135_v50 = vpack.c.bf16 %v1494_v49, %v1493_v48 }
 0x3d6   : > { %v1044_v53 = vsel %vm878_vm5, %v1043_v51, -inf }
 0x3d7   : > { %1045 = vmax.xlane.f32.xlu1 %v1044_v53  ;;  %v1496_v53 = vld [vmem:[#allocation9 + $0x58] sm:$0xff] }
 0x3e8   : > { %1140 = vrot.lane.b32.xlu1 %v689_v19, %s2485_s21 }
 0x3ec   : > { %1227 = vrot.lane.b32.xlu1 %v2800_v27, %s2485_s21 }
 0x3f0   : > { %1313 = vrot.lane.b32.xlu1 %v689_v19, %s2486_s11 }
 0x3f4   : > { %1311 = vrot.lane.b32.xlu1 %v598_v24, %s2486_s11 }
 0x464   : > { %v1046_v54 = vpop.xlane.xlu1 %1045 }
 0x465   : > { %v1047_v55 = vsub.f32 %v1043_v51, %v1046_v54  ;;  %v1495_v51 = vld [vmem:[#allocation9 + $0x50] sm:$0xff] }
 0x466   : > { %v2138_v54 = vpack.c.bf16 %v1496_v53, %v1495_v51 }
 0x467   : > { %v1048_v56 = vmul.f32 1.442695, %v1047_v55 }
 0x468   : > { %v1141_v57 = vpop.permute.xlu1 %1140 }
 0x469   : > { %2254 = vpow2.f32 %v1048_v56 }
 0x46c   : > { %v1228_v60 = vpop.permute.xlu1 %1227 }
 0x470   : > { %v1314_v9 = vpop.permute.xlu1 %1313 }
 0x473   : > { %v2255_v58 = vpop.eup %2254 }
 0x474   : > { %1993 = vmatmul.mubr.msk.f32.vlgmr.msra.gmra.mrb[8].mxu1 %vm878_vm5, %v2255_v58  ;;  %v1312_v11 = vpop.permute.xlu1 %1311  ;;  %v1050_v20 = vsel %vm878_vm5, %v2255_v58, 0.0  ;;  %v1497_v58 = vld [vmem:[#allocation9 + $0x60] sm:$0xff] }
 0x475   : > { %1996 = vmatpush3.xpose.msk.msra.mxu1 %vm794_vm2, %v1141_v57  ;;  %1997 = vmatprep.mubr.msk.f32.mxu1 %vm2481_vm0, %v2482_v1 }
 0x476   : > { %2000 = vmatprep.subr.mxu1 %v2482_v1 }
 0x478   : > { %1998 = vmatmul.mubr.msk.f32.vlgmr.msra.gmra.mrb[10].mxu1 %vm794_vm2, %v1139_v59  ;;  %v1498_v59 = vld [vmem:[#allocation9 + $0x68] sm:$0xff] }
 0x479   : > { %2001 = vmatpush3.msra.mxu1 %v1228_v60  ;;  %2002 = vmatprep.mubr.msk.f32.mxu1 %vm2481_vm0, %v2482_v1  ;;  %v2141_v60 = vpack.c.bf16 %v1498_v59, %v1497_v58 }
 0x47a   : > { %2005 = vmatprep.subr.mxu1 %v2482_v1 }
 0x547   : > { %v1126_v61 = vpop.f32.mrb[8].mxu1 }
 0x548   : > { %v1994_v62 = vpop.f32.mrb[9].mxu1 }
 0x549   : > { %v1500_v62 = vld [vmem:[#allocation9 + $0x78] sm:$0xff] }
 0x54b   : > { %v1212_v63 = vpop.f32.mrb[10].mxu1 }
 0x54c   : > { %v1216_v2 = vsel %vm875_vm4, -1e+09, %v1212_v63  ;;  %v1999_v3 = vpop.f32.mrb[11].mxu1 }
 0x54d   : > { %v1217_v4 = vadd.f32 %v1216_v2, %v2808_v33 }
 0x54f   : > { %v1218_v5 = vsel %vm878_vm5, %v1217_v4, -inf }
 0x550   : > { %1219 = vmax.xlane.f32.xlu0 %v1218_v5 }
 0x566   : > { %1400 = vrot.lane.b32.xlu0 %v2800_v27, %s2486_s11 }
 0x5dd   : > { %v1220_v6 = vpop.xlane.xlu0 %1219 }
 0x5de   : > { %v1221_v7 = vsub.f32 %v1217_v4, %v1220_v6 }
 0x5e0   : > { %v1222_v8 = vmul.f32 1.442695, %v1221_v7 }
 0x5e1   : > { %v1401_v12 = vpop.permute.xlu0 %1400 }
 0x5e2   : > { %2256 = vpow2.f32 %v1222_v8  ;;  %v1779_v8 = vld [vmem:[%s2956_s9] ss:$0 sm:$0xff] }
 0x5ec   : > { %v2257_v10 = vpop.eup %2256 }
 0x5ed   : > { %2003 = vmatmul.mubr.msk.f32.vlgmr.msra.gmra.mrb[12].mxu1 %vm878_vm5, %v2257_v10  ;;  %v1224_v21 = vsel %vm878_vm5, %v2257_v10, 0.0 }
 0x5ee   : > { %2006 = vmatpush3.xpose.msk.msra.mxu1 %vm794_vm2, %v1314_v9  ;;  %2007 = vmatprep.mubr.msk.f32.mxu1 %vm2481_vm0, %v2482_v1 }
 0x5ef   : > { %2010 = vmatprep.subr.mxu1 %v2482_v1 }
 0x5f1   : > { %2008 = vmatmul.mubr.msk.f32.vlgmr.msra.gmra.mrb[14].mxu1 %vm794_vm2, %v1312_v11 }
 0x5f2   : > { %2011 = vmatpush3.msra.mxu1 %v1401_v12  ;;  %2012 = vmatprep.mubr.msk.f32.mxu1 %vm2481_vm0, %v2482_v1  ;;  %v885_v1 = vsel %vm878_vm5, %v2817_v43, 0.0  ;;  %v1490_v43 = vld [vmem:[#allocation9 + $0x28] sm:$0xff] }
 0x5f3   : > { %v2129_v44 = vpack.c.bf16 %v1490_v43, %v1489_v42 }
 0x5f5   : > { %2130 = vmatpush3.bf16.msra.mxu0 %v2129_v44 }
 0x5f6   : > { %2131 = vmatprep.subr.bf16.mxu0 %v2480_v0 }
 0x6c0   : > { %v1299_v13 = vpop.f32.mrb[12].mxu1 }
 0x6c1   : > { %v2004_v14 = vpop.f32.mrb[13].mxu1 }
 0x6c4   : > { %v1385_v15 = vpop.f32.mrb[14].mxu1 }
 0x6c5   : > { %v1389_v16 = vsel %vm875_vm4, -1e+09, %v1385_v15  ;;  %v2009_v17 = vpop.f32.mrb[15].mxu1 }
 0x6c6   : > { %v1390_v18 = vadd.f32 %v1389_v16, %v2808_v33 }
 0x6c8   : > { %v1391_v19 = vsel %vm878_vm5, %v1390_v18, -inf }
 0x6c9   : > { %1392 = vmax.xlane.f32.xlu1 %v1391_v19 }
 0x6cd   : > { %1051 = vadd.xlane.f32.xlu1 %v1050_v20  ;;  %v1780_v20 = vld [vmem:[%s2992_s23] ss:$0 sm:$0xff] }
 0x6d1   : > { %1225 = vadd.xlane.f32.xlu1 %v1224_v21  ;;  %v1781_v21 = vld [vmem:[%s2993_s3] ss:$0 sm:$0xff] }
 0x6d5   : > { %886 = vadd.xlane.f32.xlu1 %v885_v1 }
 0x756   : > { %v1393_v22 = vpop.xlane.xlu1 %1392 }
 0x757   : > { %v1394_v23 = vsub.f32 %v1390_v18, %v1393_v22 }
 0x759   : > { %v1395_v24 = vmul.f32 1.442695, %v1394_v23 }
 0x75a   : > { %v1052_v25 = vpop.xlane.xlu1 %1051 }
 0x75b   : > { %2258 = vpow2.f32 %v1395_v24 }
 0x75c   : > { %2260 = vrcp.f32 %v1052_v25 }
 0x75e   : > { %v1226_v26 = vpop.xlane.xlu1 %1225 }
 0x75f   : > { %2262 = vrcp.f32 %v1226_v26 }
 0x762   : > { %v887_v27 = vpop.xlane.xlu1 %886 }
 0x763   : > { %2264 = vrcp.f32 %v887_v27 }
 0x765   : > { %v2259_v28 = vpop.eup %2258 }
 0x766   : > { %v2261_v29 = vpop.eup %2260  ;;  %2013 = vmatmul.mubr.msk.f32.vlgmr.msra.gmra.mrb[16].mxu1 %vm878_vm5, %v2259_v28  ;;  %v1397_v30 = vsel %vm878_vm5, %v2259_v28, 0.0 }
 0x767   : > { %1398 = vadd.xlane.f32.xlu0 %v1397_v30  ;;  %v1131_v31 = vmul.f32 %v2261_v29, %v1126_v61  ;;  %v1499_v61 = vld [vmem:[#allocation9 + $0x70] sm:$0xff] }
 0x768   : > { %v2144_v63 = vpack.c.bf16 %v1500_v62, %v1499_v61 }
 0x769   : > { %v2263_v32 = vpop.eup %2262  ;;  %1133 = vrot.lane.b32.xlu1 %v1131_v31, %s2486_s11  ;;  %s2382_s11 = scalar_lea.vmem %s2902_s26, 128 }
 0x76a   : > { %v1304_v33 = vmul.f32 %v2263_v32, %v1299_v13  ;;  %p2383_p8 = scmp.ne.s32.totalorder %s2902_s26, %s2382_s11  ;;  %p2390_p3 = scmp.lt.s32.totalorder %s2388_s14, %s2382_s11 }
 0x76c   : > { %p2384_p11 = pnand %p2383_p8, %p2995_p10  ;;  %p2391_p5 = por %p2390_p3, %p2389_p2 }
 0x76d   : > { %v2265_v34 = vpop.eup %2264  ;;  %1306 = vrot.lane.b32.xlu1 %v1304_v33, %s2485_s21  ;;  %s1609_s21 = scalar_lea.sflag [#allocation5], %s488_s17 }
 0x76e   : > { %v962_v35 = vmul.f32 %v2265_v34, %v2829_v46  ;;  %v2132_v46 = vpack.c.bf16 %v1492_v47, %v1491_v45  ;;  %p2385_p0 = pneg %p2384_p11 }
 0x770   : > { %963 = vst.msk [vmem:[#allocation2] sm:$0xff] %vm794_vm2, %v962_v35  ;;  %2133 = vmatpush3.bf16.msra.mxu0 %v2132_v46  ;;  %p2392_p6 = pnand %p2391_p5, %p2385_p0 }
 0x771   : > { %2134 = vmatprep.subr.bf16.mxu0 %v2480_v0 }
 0x774   : > { %2136 = vmatpush3.bf16.msra.mxu0 %v2135_v50 }
 0x775   : > { %2137 = vmatprep.subr.bf16.mxu0 %v2480_v0 }
 0x778   : > { %2139 = vmatpush3.bf16.msra.mxu0 %v2138_v54 }
 0x779   : > { %2140 = vmatprep.subr.bf16.mxu0 %v2480_v0 }
 0x77c   : > { %2142 = vmatpush3.bf16.msra.mxu0 %v2141_v60 }
 0x77d   : > { %2143 = vmatprep.subr.bf16.mxu0 %v2480_v0 }
 0x780   : > { %2145 = vmatpush3.bf16.msra.mxu0 %v2144_v63 }
 0x7db   : > { %v1134_v55 = vpop.permute.xlu1 %1133 }
 0x7dc   : > { %1137 = vst.msk [vmem:[#allocation2] sm:$0xff] %vm1136_vm6, %v1134_v55 }
 0x7df   : > { %v1307_v56 = vpop.permute.xlu1 %1306 }
 0x7e0   : > { %1310 = vst.msk [vmem:[#allocation2] sm:$0xff] %vm1309_vm7, %v1307_v56 }
 0x7f4   : > { %v1399_v57 = vpop.xlane.xlu0 %1398 }
 0x7f5   : > { %2266 = vrcp.f32 %v1399_v57 }
 0x7ff   : > { %v2267_v2 = vpop.eup %2266 }
 0x839   : > { %v1472_v3 = vpop.f32.mrb[16].mxu1 }
 0x83a   : > { %v1477_v4 = vmul.f32 %v2267_v2, %v1472_v3  ;;  %v2014_v5 = vpop.f32.mrb[17].mxu1 }
 0x83c   : > { %1479 = vrot.lane.b32.xlu1 %v1477_v4, %s2484_s30 }
 0x8ae   : > { %v1480_v6 = vpop.permute.xlu1 %1479 }
 0x8af   : > { %1483 = vst.msk [vmem:[#allocation2] sm:$0xff] %vm1482_vm8, %v1480_v6 }
 0x8b6   : > { %v1484_v7 = vld [vmem:[#allocation2] sm:$0xff] }
 0x8b7   : > { %2048 = vmatmul.mubr.f32.vlgmr.msra.gmra.mrb[4].mxu0 %v1484_v7 }
 0x98a   : > { %v1574_v9 = vpop.f32.mrb[4].mxu0 }
 0x98b   : > { %v1575_v10 = vadd.f32 %v1779_v8, %v1574_v9  ;;  %v2049_v0 = vpop.f32.mrb[5].mxu0 }
 0x98d   : > { %v1578_v11 = vadd.f32 %v1575_v10, %v2758_v52 }
 0x98f   : > { %1579 = vadd.xlane.f32.xlu0 %v1578_v11 }
 0xa1c   : > { %v1580_v12 = vpop.xlane.xlu0 %1579 }
 0xa1d   : > { %v1582_v13 = vmul.f32 0.0078125, %v1580_v12 }
 0xa1f   : > { %v1583_v14 = vsub.f32 %v1578_v11, %v1582_v13 }
 0xa21   : > { %v1584_v15 = vmul.f32 %v1583_v14, %v1583_v14 }
 0xa23   : > { %1585 = vadd.xlane.f32.xlu1 %v1584_v15 }
 0xab0   : > { %v1586_v16 = vpop.xlane.xlu1 %1585 }
 0xab1   : > { %v1587_v17 = vmul.f32 0.0078125, %v1586_v16 }
 0xab3   : > { %v1589_v18 = vadd.f32 1e-12, %v1587_v17 }
 0xab5   : > { %2268 = vrsqrt.f32 %v1589_v18 }
 0xabf   : > { %v2269_v19 = vpop.eup %2268 }
 0xac0   : > { %v1591_v52 = vmul.f32 %v2269_v19, %v1583_v14 }
 0xac2   : > { %v1598_v1 = vmul.f32 %v1780_v20, %v1591_v52 }
 0xac4   : > { %v1606_v22 = vadd.f32 %v1781_v21, %v1598_v1 }
 0xac6   : > { %1607 = vst [vmem:[%s490_s12] sm:$0xff] %v1606_v22 }
 0xac7   : > { %2395 = shalt.err (!%p2392_p6)
}
 0xac8   : > { %s2396_s17 = scalar_lea.hbm %s2900_s25, 128  ;;  %s2400_s19 = scalar_lea.hbm %s2994_s27, 256 }
 0xac9   : > { %p2397_p7 = scmp.ne.s32.totalorder %s2900_s25, %s2396_s17  ;;  %p2401_p4 = scmp.lt.u32.totalorder %s2900_s25, %s2994_s27 }
 0xaca   : > { %p2402_p1 = scmp.lt.u32.totalorder %s2400_s19, %s2396_s17  ;;  %p2404_p8 = scmp.lt.u32.totalorder %s2396_s17, %s2900_s25 }
 0xacb   : > { %p2398_p9 = pnand %p2397_p7, %p2995_p10 }
 0xacc   : > { %p2403_p13 = por %p2402_p1, %p2401_p4 }
 0xacd   : > { %p2399_p12 = pneg %p2398_p9 }
 0xace   : > { %p2405_p11 = por %p2404_p8, %p2403_p13 }
 0xad0   : > { %p2406_p0 = pnand %p2405_p11, %p2399_p12 }
 0xad2   : > { %2409 = shalt.err (!%p2406_p0)
}
 0xad3   : > { %2162 = dma.vmem_to_hbm [thread:$0]  (%p2995_p10), %s2902_s26, 128, %s2900_s25, %s1609_s21  }
 0xad4 PF: > { %s2996_s16 = sld [smem:[#allocation19_spill]]  ;;  %s2997_s3 = sld [smem:[#allocation16_spill]] }
 0xad5   : > { %s2998_s10 = sld [smem:[#allocation21_spill]] }
 0xada   : > { %p2189_p2 = scmp.ge.s32.totalorder %s2996_s16, 2  ;;  %s1635_s12 = sand.u32 1, %s2997_s3  }
 0xadb   : > { %p2999_p3 = scmp.ne.s32.totalorder %s2998_s10, 0  ;;  %s1636_s15 = scalar_lea.sflag [#allocation5], %s1635_s12 }
 0xadd   : > { %p2178_p5 = pnand %p2189_p2, %p2999_p3 }
 0xadf   : > { %2447 = dma.done.wait (!%p2178_p5), %s1636_s15, 128  }
 0xae0   : > { %2449 = vsyncadd (!%p2178_p5), %s1636_s15, 4294967168  ;;  %s28_s26 = sadd.s32 1, %s2996_s16   ;;  %s3000_s30 = sld [smem:[#allocation17_spill]] }
 0xae1   : > { %p25_p6 = scmp.ge.s32.totalorder %s28_s26, 4   ;;  %s3001_s23 = sld [smem:[#allocation22_spill]] }
 0xae2   : > { %s3002_s24 = sld [smem:[#allocation18_spill]]  ;;  %s3003_s25 = sld [smem:[#allocation20_spill]] }
 0xae3   : > { %s3004_s21 = smov %s2456_s22  ;;  %27 = sbr.rel (!%p25_p6) target bundleno = 12 (0xc), region = 125 }
 0xae6   : > { %s3005_s22 = smov %s3000_s30 }
 0xaea   :  { %1641 = vsyncpa [#allocation4], 1 }
 0xaeb   :  { %1643 = vsyncpa [#allocation4 + $0x1], 1 }
 0xaec   :  { %1644 = vsyncpa [#allocation7], 1 }
 0xaed   :  { %1645 = vsyncpa [#allocation10], 1 }
 0xaee   :  { %1646 = vsyncpa [#allocation5], 1 }
 0xaef   :  { %1648 = vsyncpa [#allocation5 + $0x1], 1 }

</bundles_post_ra>
